<compile_context>
chip_gen: v6e
topology: v6e:2x2x1
jax: 0.10.0
libtpu: 0.0.40
codegen_flags: <defaults>
</compile_context>

<pallas_src>
import jax
import jax.numpy as jnp
import numpy as np
from jax.experimental import pallas as pl
from jax.experimental.pallas import tpu as pltpu

NEG_INF = -1e30  # softmax mask value for the padded kernel rows


def make_carafe_kernel(k2, k2p, up2, C, C2, TM, precision):
    """k2 = ks*ks taps, k2p = taps padded to 16, TM = lanes (pixels) per grid step."""

    def kernel(taps_ref, we_ref, be_ref, wo_ref, bo_ref, out_ref):
        taps = taps_ref[...]                                  # (k2*C, TM), lane-dense

        # ---- fused down + encoder conv: ONE im2col matmul on the MXU --------
        enc = jnp.dot(we_ref[...], taps,
                      preferred_element_type=jnp.float32,
                      precision=precision) + be_ref[...]      # (up2*k2p, TM)
        enc = enc.reshape(up2, k2p, TM)                       # 16-row groups, 8-aligned

        # ---- softmax over the k2 taps per sub-pixel u ------------------------
        # (rows k2..k2p carry -1e30 bias -> exp underflows to exactly 0)
        m = jnp.max(enc, axis=1, keepdims=True)               # (up2, 1, TM)
        e = jnp.exp(enc - m)
        s = jnp.sum(e, axis=1, keepdims=True)
        kern = e * pl.reciprocal(s, approx=True)              # (up2, k2p, TM), EUP recip

        # ---- content-aware reassembly: unrolled k2-step FMA ------------------
        # acc[u, c, m] = sum_p kern[u, p, m] * taps[p, c, m]   (pure VPU work;
        # one kern row per step -> no (up2, k2, C, TM) intermediate).
        taps_k = taps.reshape(k2, C, TM)                      # (k2, C, TM)
        acc = kern[:, 0, :][:, None, :] * taps_k[0][None, :, :]
        for p in range(1, k2):
            acc = acc + kern[:, p, :][:, None, :] * taps_k[p][None, :, :]
        acc = acc.reshape(up2 * C, TM)                        # (up2*C, TM)

        # ---- single 1x1 "out" conv for all up2 sub-pixels (block-diag W) -----
        z = jnp.dot(wo_ref[...], acc,
                    preferred_element_type=jnp.float32,
                    precision=precision) + bo_ref[...]        # (up2*C2, TM)
        out_ref[...] = z                                      # lane-dense store

    return kernel


def _pick_lane_tile(HW, target=512):
    """Largest divisor of HW that is <= target and MXU-lane aligned."""
    for align in (256, 128):          # v6e/v7x native lane width first, then v5e
        cand = (target // align) * align
        while cand >= align:
            if HW % cand == 0:
                return cand
            cand -= align
    return HW                         # tiny images: whole row (masked stores, still correct)


def carafe_pallas(x_nchw, params, kernel_size=3, up_factor=2,
                  precision=jax.lax.Precision.HIGHEST):
    """CARAFE forward. x_nchw: (N, C, H, W) float32. Returns (N, c2, H*up, W*up)."""
    Wd, bd, We, be, Wo, bo = params          # PyTorch OIHW conv weights / biases
    N, C, H, W = x_nchw.shape
    ks, up = kernel_size, up_factor
    k2, up2 = ks * ks, up * up
    k2p = 16                                  # k2 padded to an 8-aligned softmax group
    Cd = Wd.shape[0]
    Ce = We.shape[0]                          # = up2 * k2 (PyTorch channel order c_k*up2 + u)
    C2 = Wo.shape[0]
    HW = H * W
    pad = ks // 2
    KC = k2 * C
    CeP = up2 * k2p
    f32 = jnp.float32
    hp = jax.lax.Precision.HIGHEST            # exact weight folding in the wrapper

    x = x_nchw.astype(f32)

    # ---- lane tiling: grid = (batch, spatial tiles), both parallel -----------
    TM = _pick_lane_tile(HW)
    nM = HW // TM

    # ---- wrapper glue: fold "down" conv into the encoder weights (exact) -----
    Wd_mat = Wd.reshape(Cd, C).astype(f32)                       # (Cd, C)
    We_r = We.reshape(Ce, Cd, k2).astype(f32)                    # (Ce, Cd, k2)
    Wf = jnp.einsum('odp,dc->opc', We_r, Wd_mat, precision=hp)   # (Ce, k2, C)
    Wf = Wf.reshape(Ce, KC)                                      # col = p*C + c
    # reorder output channels c_k*up2 + u -> (u, c_k), pad k2 -> k2p
    Wf = Wf.reshape(k2, up2, KC).transpose(1, 0, 2)              # (up2, k2, KC)
    W_enc = jnp.zeros((up2, k2p, KC), f32).at[:, :k2, :].set(Wf).reshape(CeP, KC)

    # per-pixel bias map = conv of constant-bd image (zero padded) + be (exact);
    # depends only on the spatial position -> shape (CeP, HW), NOT tiled by batch.
    tconst = jnp.broadcast_to(bd.reshape(1, Cd, 1, 1).astype(f32), (1, Cd, H, W))
    bmap = jax.lax.conv_general_dilated(
        tconst, We.astype(f32), (1, 1), [(pad, pad), (pad, pad)],
        dimension_numbers=('NCHW', 'OIHW', 'NCHW'), precision=hp)[0]
    bmap = bmap + be.astype(f32)[:, None, None]                  # (Ce, H, W)
    bmap = bmap.reshape(k2, up2, HW).transpose(1, 0, 2)          # (up2, k2, HW)
    b_enc = jnp.full((up2, k2p, HW), NEG_INF, f32).at[:, :k2, :].set(bmap)
    b_enc = b_enc.reshape(CeP, HW)

    # block-diagonal "out" weights -> one matmul for all up2 sub-pixels
    Wo_mat = Wo.reshape(C2, C).astype(f32)
    Wo_block = jnp.kron(jnp.eye(up2, dtype=f32), Wo_mat)         # (up2*C2, up2*C)
    bo_block = jnp.tile(bo.reshape(C2, 1).astype(f32), (up2, 1)) # (up2*C2, 1)

    # ---- wrapper glue: im2col tap extraction (layout only) -------------------
    # TODO(synk): for memory-bound deployments (esp. v5e) form the 9 taps
    # in-kernel from a halo'd x tile (manual DMA + shifted VMEM slices) instead
    # of materializing the 9x-sized taps stream in HBM here.
    xp = jnp.pad(x, ((0, 0), (0, 0), (pad, pad), (pad, pad)))
    taps = jnp.stack([xp[:, :, dh:dh + H, dw:dw + W]
                      for dh in range(ks) for dw in range(ks)], axis=1)  # (N,k2,C,H,W)
    taps = taps.reshape(N, KC, HW)                                       # row p*C+c, lane h*W+w

    kernel = make_carafe_kernel(k2, k2p, up2, C, C2, TM, precision)

    grid_spec = pltpu.PrefetchScalarGridSpec(
        num_scalar_prefetch=0,
        grid=(N, nM),
        in_specs=[
            pl.BlockSpec((None, KC, TM), lambda n, m: (n, 0, m)),    # x taps
            pl.BlockSpec((CeP, KC), lambda n, m: (0, 0)),            # fused encoder weight
            pl.BlockSpec((CeP, TM), lambda n, m: (0, m)),            # encoder bias map (spatial)
            pl.BlockSpec((up2 * C2, up2 * C), lambda n, m: (0, 0)),  # block-diag out weight
            pl.BlockSpec((up2 * C2, 1), lambda n, m: (0, 0)),        # out bias
        ],
        out_specs=pl.BlockSpec((None, up2 * C2, TM), lambda n, m: (n, 0, m)),
    )

    # Per-step VMEM = 2x taps tile (double-buffered) + resident weights/bias +
    # in-kernel intermediates; a few MB at TM<=512 even for large C, so well
    # inside v7x's 64 MiB physical VMEM.  Explicit limit for portability.
    z = pl.pallas_call(
        kernel,
        out_shape=jax.ShapeDtypeStruct((N, up2 * C2, HW), f32),
        grid_spec=grid_spec,
        compiler_params=pltpu.CompilerParams(
            dimension_semantics=("parallel", "parallel"),
            vmem_limit_bytes=48 * 1024 * 1024),
    )(taps, W_enc, b_enc, Wo_block, bo_block)

    # glue: z[n, (i*up+j)*C2 + c2, h*W + w] -> out[n, c2, h*up+i, w*up+j]
    z = z.reshape(N, up, up, C2, H, W)
    out = jnp.transpose(z, (0, 3, 4, 1, 5, 2)).reshape(N, C2, H * up, W * up)
    return out


def carafe_reference(x, params, kernel_size=3, up_factor=2):
    """Pure-JAX port of the PyTorch forward (NCHW), for validation."""
    Wd, bd, We, be, Wo, bo = params
    N, C, H, W = x.shape
    ks, up = kernel_size, up_factor
    k2, up2 = ks * ks, up * up
    p = ks // 2
    hp = jax.lax.Precision.HIGHEST
    dn = ('NCHW', 'OIHW', 'NCHW')

    t = jax.lax.conv_general_dilated(x, Wd, (1, 1), 'VALID',
                                     dimension_numbers=dn, precision=hp)
    t = t + bd[None, :, None, None]
    enc = jax.lax.conv_general_dilated(t, We, (1, 1), [(p, p), (p, p)],
                                       dimension_numbers=dn, precision=hp)
    enc = enc + be[None, :, None, None]

    # pixel_shuffle
    kt = enc.reshape(N, k2, up, up, H, W).transpose(0, 1, 4, 2, 5, 3)
    kt = kt.reshape(N, k2, H * up, W * up)
    kt = jax.nn.softmax(kt, axis=1)
    # unfold(2, up, up).unfold(3, up, up) -> (N, k2, H, W, up*up)
    kt = kt.reshape(N, k2, H, up, W, up).transpose(0, 1, 2, 4, 3, 5)
    kt = kt.reshape(N, k2, H, W, up2).transpose(0, 2, 3, 1, 4)        # (N,H,W,k2,up2)

    xp = jnp.pad(x, ((0, 0), (0, 0), (p, p), (p, p)))
    xu = jnp.stack([xp[:, :, dh:dh + H, dw:dw + W]
                    for dh in range(ks) for dw in range(ks)], axis=-1)  # (N,C,H,W,k2)
    xu = xu.transpose(0, 2, 3, 1, 4)                                    # (N,H,W,C,k2)

    out = jnp.einsum('nhwcp,nhwpu->nhwcu', xu, kt, precision=hp)
    out = out.reshape(N, H, W, C * up2).transpose(0, 3, 1, 2)
    out = out.reshape(N, C, up, up, H, W).transpose(0, 1, 4, 2, 5, 3)
    out = out.reshape(N, C, H * up, W * up)
    out = jax.lax.conv_general_dilated(out, Wo, (1, 1), 'VALID',
                                       dimension_numbers=dn, precision=hp)
    out = out + bo[None, :, None, None]
    return out


if __name__ == "__main__":
    # module hyper-params: c1=8, c2=4, kernel_size=3, up_factor=2
    N, c1, c2, H, W = 2, 8, 4, 16, 16
    ks, up = 3, 2
    Cd = c1 // 4
    Ce = up * up * ks * ks

    key = jax.random.PRNGKey(0)
    keys = jax.random.split(key, 7)
    Wd = jax.random.normal(keys[0], (Cd, c1, 1, 1), jnp.float32) * (c1 ** -0.5)
    bd = jax.random.normal(keys[1], (Cd,), jnp.float32) * 0.1
    We = jax.random.normal(keys[2], (Ce, Cd, ks, ks), jnp.float32) * ((Cd * ks * ks) ** -0.5)
    be = jax.random.normal(keys[3], (Ce,), jnp.float32) * 0.1
    Wo = jax.random.normal(keys[4], (c2, c1, 1, 1), jnp.float32) * (c1 ** -0.5)
    bo = jax.random.normal(keys[5], (c2,), jnp.float32) * 0.1
    x = jax.random.normal(keys[6], (N, c1, H, W), jnp.float32)
    params = (Wd, bd, We, be, Wo, bo)

    out = carafe_pallas(x, params, ks, up)
    out = jax.block_until_ready(out)

    ref = jax.block_until_ready(carafe_reference(x, params, ks, up))
    assert out.shape == (N, c2, H * up, W * up), out.shape
    # Tolerance loosened slightly vs a pure-f32 run because the softmax
    # denominator uses the EUP approximate reciprocal (per perf review).
    np.testing.assert_allclose(np.asarray(out), np.asarray(ref), rtol=5e-3, atol=5e-3)
    print("KERNEL_OK")
</pallas_src>

<mosaic_0001>
module attributes {stable_mosaic.version = 11 : i64} {
  func.func @kernel(%arg0: i32, %arg1: i32, %arg2: memref<1x72x256xf32, #tpu.memory_space<vmem>>, %arg3: memref<64x72xf32, #tpu.memory_space<vmem>>, %arg4: memref<64x256xf32, #tpu.memory_space<vmem>>, %arg5: memref<16x32xf32, #tpu.memory_space<vmem>>, %arg6: memref<16x1xf32, #tpu.memory_space<vmem>>, %arg7: memref<1x16x256xf32, #tpu.memory_space<vmem>>) attributes {dimension_semantics = [#tpu.dimension_semantics<parallel>, #tpu.dimension_semantics<parallel>], iteration_bounds = array<i64: 2, 1>, scalar_prefetch = 0 : i64, scratch_operands = 0 : i64, tpu.core_type = #tpu.core_type<tc>, window_params = [{transform_indices = @transform_0, window_bounds = array<i64: 1, 72, 256>}, {pipeline_mode = #tpu.pipeline_mode<synchronous>, transform_indices = @transform_1, window_bounds = array<i64: 64, 72>}, {transform_indices = @transform_2, window_bounds = array<i64: 64, 256>}, {pipeline_mode = #tpu.pipeline_mode<synchronous>, transform_indices = @transform_3, window_bounds = array<i64: 16, 32>}, {pipeline_mode = #tpu.pipeline_mode<synchronous>, transform_indices = @transform_4, window_bounds = array<i64: 16, 1>}, {transform_indices = @transform_5, window_bounds = array<i64: 1, 16, 256>}]} {
    %c0 = arith.constant 0 : index
    %c0_0 = arith.constant 0 : index
    %c0_1 = arith.constant 0 : index
    %0 = vector.load %arg2[%c0, %c0_0, %c0_1] : memref<1x72x256xf32, #tpu.memory_space<vmem>>, vector<1x72x256xf32>
    %1 = vector.shape_cast %0 : vector<1x72x256xf32> to vector<72x256xf32>
    %c0_2 = arith.constant 0 : index
    %c0_3 = arith.constant 0 : index
    %2 = vector.load %arg3[%c0_2, %c0_3] : memref<64x72xf32, #tpu.memory_space<vmem>>, vector<64x72xf32>
    %cst = arith.constant dense<0.000000e+00> : vector<64x256xf32>
    %3 = tpu.matmul %2, %1, %cst {dimension_numbers = #tpu.dot_dimension_numbers<[1], [0], [0], [1], [0, 0, 1, 1], [], []>, precision = #tpu.contract_precision<fp32>} : vector<64x72xf32>, vector<72x256xf32>, vector<64x256xf32> -> vector<64x256xf32>
    %c0_4 = arith.constant 0 : index
    %c0_5 = arith.constant 0 : index
    %4 = vector.load %arg4[%c0_4, %c0_5] : memref<64x256xf32, #tpu.memory_space<vmem>>, vector<64x256xf32>
    %5 = arith.addf %3, %4 : vector<64x256xf32>
    %6 = vector.shape_cast %5 : vector<64x256xf32> to vector<4x16x256xf32>
    %cst_6 = arith.constant dense<0xFF800000> : vector<4x256xf32>
    %7 = vector.multi_reduction <maximumf>, %6, %cst_6 [1] : vector<4x16x256xf32> to vector<4x256xf32>
    %8 = vector.shape_cast %7 : vector<4x256xf32> to vector<4x1x256xf32>
    %9 = vector.broadcast %8 : vector<4x1x256xf32> to vector<4x16x256xf32>
    %10 = arith.subf %6, %9 : vector<4x16x256xf32>
    %11 = math.exp %10 : vector<4x16x256xf32>
    %cst_7 = arith.constant dense<0.000000e+00> : vector<4x256xf32>
    %12 = vector.multi_reduction <add>, %11, %cst_7 [1] : vector<4x16x256xf32> to vector<4x256xf32>
    %13 = vector.shape_cast %12 : vector<4x256xf32> to vector<4x1x256xf32>
    %14 = tpu.reciprocal %13 {approx = true} : vector<4x1x256xf32> -> vector<4x1x256xf32>
    %15 = vector.broadcast %14 : vector<4x1x256xf32> to vector<4x16x256xf32>
    %16 = arith.mulf %11, %15 : vector<4x16x256xf32>
    %17 = vector.shape_cast %1 : vector<72x256xf32> to vector<9x8x256xf32>
    %18 = vector.extract_strided_slice %16 {offsets = [0, 0, 0], sizes = [4, 1, 256], strides = [1, 1, 1]} : vector<4x16x256xf32> to vector<4x1x256xf32>
    %19 = vector.shape_cast %18 : vector<4x1x256xf32> to vector<4x256xf32>
    %20 = vector.shape_cast %19 : vector<4x256xf32> to vector<4x1x256xf32>
    %21 = vector.extract_strided_slice %17 {offsets = [0, 0, 0], sizes = [1, 8, 256], strides = [1, 1, 1]} : vector<9x8x256xf32> to vector<1x8x256xf32>
    %22 = vector.shape_cast %21 : vector<1x8x256xf32> to vector<8x256xf32>
    %23 = vector.shape_cast %22 : vector<8x256xf32> to vector<1x8x256xf32>
    %24 = vector.broadcast %20 : vector<4x1x256xf32> to vector<4x8x256xf32>
    %25 = vector.broadcast %23 : vector<1x8x256xf32> to vector<4x8x256xf32>
    %26 = arith.mulf %24, %25 : vector<4x8x256xf32>
    %27 = vector.extract_strided_slice %16 {offsets = [0, 1, 0], sizes = [4, 1, 256], strides = [1, 1, 1]} : vector<4x16x256xf32> to vector<4x1x256xf32>
    %28 = vector.shape_cast %27 : vector<4x1x256xf32> to vector<4x256xf32>
    %29 = vector.shape_cast %28 : vector<4x256xf32> to vector<4x1x256xf32>
    %30 = vector.extract_strided_slice %17 {offsets = [1, 0, 0], sizes = [1, 8, 256], strides = [1, 1, 1]} : vector<9x8x256xf32> to vector<1x8x256xf32>
    %31 = vector.shape_cast %30 : vector<1x8x256xf32> to vector<8x256xf32>
    %32 = vector.shape_cast %31 : vector<8x256xf32> to vector<1x8x256xf32>
    %33 = vector.broadcast %29 : vector<4x1x256xf32> to vector<4x8x256xf32>
    %34 = vector.broadcast %32 : vector<1x8x256xf32> to vector<4x8x256xf32>
    %35 = arith.mulf %33, %34 : vector<4x8x256xf32>
    %36 = arith.addf %26, %35 : vector<4x8x256xf32>
    %37 = vector.extract_strided_slice %16 {offsets = [0, 2, 0], sizes = [4, 1, 256], strides = [1, 1, 1]} : vector<4x16x256xf32> to vector<4x1x256xf32>
    %38 = vector.shape_cast %37 : vector<4x1x256xf32> to vector<4x256xf32>
    %39 = vector.shape_cast %38 : vector<4x256xf32> to vector<4x1x256xf32>
    %40 = vector.extract_strided_slice %17 {offsets = [2, 0, 0], sizes = [1, 8, 256], strides = [1, 1, 1]} : vector<9x8x256xf32> to vector<1x8x256xf32>
    %41 = vector.shape_cast %40 : vector<1x8x256xf32> to vector<8x256xf32>
    %42 = vector.shape_cast %41 : vector<8x256xf32> to vector<1x8x256xf32>
    %43 = vector.broadcast %39 : vector<4x1x256xf32> to vector<4x8x256xf32>
    %44 = vector.broadcast %42 : vector<1x8x256xf32> to vector<4x8x256xf32>
    %45 = arith.mulf %43, %44 : vector<4x8x256xf32>
    %46 = arith.addf %36, %45 : vector<4x8x256xf32>
    %47 = vector.extract_strided_slice %16 {offsets = [0, 3, 0], sizes = [4, 1, 256], strides = [1, 1, 1]} : vector<4x16x256xf32> to vector<4x1x256xf32>
    %48 = vector.shape_cast %47 : vector<4x1x256xf32> to vector<4x256xf32>
    %49 = vector.shape_cast %48 : vector<4x256xf32> to vector<4x1x256xf32>
    %50 = vector.extract_strided_slice %17 {offsets = [3, 0, 0], sizes = [1, 8, 256], strides = [1, 1, 1]} : vector<9x8x256xf32> to vector<1x8x256xf32>
    %51 = vector.shape_cast %50 : vector<1x8x256xf32> to vector<8x256xf32>
    %52 = vector.shape_cast %51 : vector<8x256xf32> to vector<1x8x256xf32>
    %53 = vector.broadcast %49 : vector<4x1x256xf32> to vector<4x8x256xf32>
    %54 = vector.broadcast %52 : vector<1x8x256xf32> to vector<4x8x256xf32>
    %55 = arith.mulf %53, %54 : vector<4x8x256xf32>
    %56 = arith.addf %46, %55 : vector<4x8x256xf32>
    %57 = vector.extract_strided_slice %16 {offsets = [0, 4, 0], sizes = [4, 1, 256], strides = [1, 1, 1]} : vector<4x16x256xf32> to vector<4x1x256xf32>
    %58 = vector.shape_cast %57 : vector<4x1x256xf32> to vector<4x256xf32>
    %59 = vector.shape_cast %58 : vector<4x256xf32> to vector<4x1x256xf32>
    %60 = vector.extract_strided_slice %17 {offsets = [4, 0, 0], sizes = [1, 8, 256], strides = [1, 1, 1]} : vector<9x8x256xf32> to vector<1x8x256xf32>
    %61 = vector.shape_cast %60 : vector<1x8x256xf32> to vector<8x256xf32>
    %62 = vector.shape_cast %61 : vector<8x256xf32> to vector<1x8x256xf32>
    %63 = vector.broadcast %59 : vector<4x1x256xf32> to vector<4x8x256xf32>
    %64 = vector.broadcast %62 : vector<1x8x256xf32> to vector<4x8x256xf32>
    %65 = arith.mulf %63, %64 : vector<4x8x256xf32>
    %66 = arith.addf %56, %65 : vector<4x8x256xf32>
    %67 = vector.extract_strided_slice %16 {offsets = [0, 5, 0], sizes = [4, 1, 256], strides = [1, 1, 1]} : vector<4x16x256xf32> to vector<4x1x256xf32>
    %68 = vector.shape_cast %67 : vector<4x1x256xf32> to vector<4x256xf32>
    %69 = vector.shape_cast %68 : vector<4x256xf32> to vector<4x1x256xf32>
    %70 = vector.extract_strided_slice %17 {offsets = [5, 0, 0], sizes = [1, 8, 256], strides = [1, 1, 1]} : vector<9x8x256xf32> to vector<1x8x256xf32>
    %71 = vector.shape_cast %70 : vector<1x8x256xf32> to vector<8x256xf32>
    %72 = vector.shape_cast %71 : vector<8x256xf32> to vector<1x8x256xf32>
    %73 = vector.broadcast %69 : vector<4x1x256xf32> to vector<4x8x256xf32>
    %74 = vector.broadcast %72 : vector<1x8x256xf32> to vector<4x8x256xf32>
    %75 = arith.mulf %73, %74 : vector<4x8x256xf32>
    %76 = arith.addf %66, %75 : vector<4x8x256xf32>
    %77 = vector.extract_strided_slice %16 {offsets = [0, 6, 0], sizes = [4, 1, 256], strides = [1, 1, 1]} : vector<4x16x256xf32> to vector<4x1x256xf32>
    %78 = vector.shape_cast %77 : vector<4x1x256xf32> to vector<4x256xf32>
    %79 = vector.shape_cast %78 : vector<4x256xf32> to vector<4x1x256xf32>
    %80 = vector.extract_strided_slice %17 {offsets = [6, 0, 0], sizes = [1, 8, 256], strides = [1, 1, 1]} : vector<9x8x256xf32> to vector<1x8x256xf32>
    %81 = vector.shape_cast %80 : vector<1x8x256xf32> to vector<8x256xf32>
    %82 = vector.shape_cast %81 : vector<8x256xf32> to vector<1x8x256xf32>
    %83 = vector.broadcast %79 : vector<4x1x256xf32> to vector<4x8x256xf32>
    %84 = vector.broadcast %82 : vector<1x8x256xf32> to vector<4x8x256xf32>
    %85 = arith.mulf %83, %84 : vector<4x8x256xf32>
    %86 = arith.addf %76, %85 : vector<4x8x256xf32>
    %87 = vector.extract_strided_slice %16 {offsets = [0, 7, 0], sizes = [4, 1, 256], strides = [1, 1, 1]} : vector<4x16x256xf32> to vector<4x1x256xf32>
    %88 = vector.shape_cast %87 : vector<4x1x256xf32> to vector<4x256xf32>
    %89 = vector.shape_cast %88 : vector<4x256xf32> to vector<4x1x256xf32>
    %90 = vector.extract_strided_slice %17 {offsets = [7, 0, 0], sizes = [1, 8, 256], strides = [1, 1, 1]} : vector<9x8x256xf32> to vector<1x8x256xf32>
    %91 = vector.shape_cast %90 : vector<1x8x256xf32> to vector<8x256xf32>
    %92 = vector.shape_cast %91 : vector<8x256xf32> to vector<1x8x256xf32>
    %93 = vector.broadcast %89 : vector<4x1x256xf32> to vector<4x8x256xf32>
    %94 = vector.broadcast %92 : vector<1x8x256xf32> to vector<4x8x256xf32>
    %95 = arith.mulf %93, %94 : vector<4x8x256xf32>
    %96 = arith.addf %86, %95 : vector<4x8x256xf32>
    %97 = vector.extract_strided_slice %16 {offsets = [0, 8, 0], sizes = [4, 1, 256], strides = [1, 1, 1]} : vector<4x16x256xf32> to vector<4x1x256xf32>
    %98 = vector.shape_cast %97 : vector<4x1x256xf32> to vector<4x256xf32>
    %99 = vector.shape_cast %98 : vector<4x256xf32> to vector<4x1x256xf32>
    %100 = vector.extract_strided_slice %17 {offsets = [8, 0, 0], sizes = [1, 8, 256], strides = [1, 1, 1]} : vector<9x8x256xf32> to vector<1x8x256xf32>
    %101 = vector.shape_cast %100 : vector<1x8x256xf32> to vector<8x256xf32>
    %102 = vector.shape_cast %101 : vector<8x256xf32> to vector<1x8x256xf32>
    %103 = vector.broadcast %99 : vector<4x1x256xf32> to vector<4x8x256xf32>
    %104 = vector.broadcast %102 : vector<1x8x256xf32> to vector<4x8x256xf32>
    %105 = arith.mulf %103, %104 : vector<4x8x256xf32>
    %106 = arith.addf %96, %105 : vector<4x8x256xf32>
    %107 = vector.shape_cast %106 : vector<4x8x256xf32> to vector<32x256xf32>
    %c0_8 = arith.constant 0 : index
    %c0_9 = arith.constant 0 : index
    %108 = vector.load %arg5[%c0_8, %c0_9] : memref<16x32xf32, #tpu.memory_space<vmem>>, vector<16x32xf32>
    %cst_10 = arith.constant dense<0.000000e+00> : vector<16x256xf32>
    %109 = tpu.matmul %108, %107, %cst_10 {dimension_numbers = #tpu.dot_dimension_numbers<[1], [0], [0], [1], [0, 0, 1, 1], [], []>, precision = #tpu.contract_precision<fp32>} : vector<16x32xf32>, vector<32x256xf32>, vector<16x256xf32> -> vector<16x256xf32>
    %c0_11 = arith.constant 0 : index
    %c0_12 = arith.constant 0 : index
    %110 = vector.load %arg6[%c0_11, %c0_12] : memref<16x1xf32, #tpu.memory_space<vmem>>, vector<16x1xf32>
    %111 = vector.broadcast %110 : vector<16x1xf32> to vector<16x256xf32>
    %112 = arith.addf %109, %111 : vector<16x256xf32>
    %c0_13 = arith.constant 0 : index
    %c0_14 = arith.constant 0 : index
    %c0_15 = arith.constant 0 : index
    %113 = vector.load %arg7[%c0_13, %c0_14, %c0_15] : memref<1x16x256xf32, #tpu.memory_space<vmem>>, vector<1x16x256xf32>
    %114 = vector.shape_cast %113 : vector<1x16x256xf32> to vector<16x256xf32>
    %115 = vector.shape_cast %112 : vector<16x256xf32> to vector<1x16x256xf32>
    tpu.vector_store %arg7[%c0_13, %c0_14, %c0_15], %115 {strides = array<i32>} : memref<1x16x256xf32, #tpu.memory_space<vmem>>, vector<1x16x256xf32>,
    return
  }
  func.func @transform_0(%arg0: i32, %arg1: i32) -> (i32, i32, i32) {
    %c0_i32 = arith.constant 0 : i32
    %c0_i32_0 = arith.constant 0 : i32
    return %arg0, %c0_i32, %arg1 : i32, i32, i32
  }
  func.func @transform_1(%arg0: i32, %arg1: i32) -> (i32, i32) {
    %c0_i32 = arith.constant 0 : i32
    %c0_i32_0 = arith.constant 0 : i32
    %c0_i32_1 = arith.constant 0 : i32
    return %c0_i32, %c0_i32_0 : i32, i32
  }
  func.func @transform_2(%arg0: i32, %arg1: i32) -> (i32, i32) {
    %c0_i32 = arith.constant 0 : i32
    %c0_i32_0 = arith.constant 0 : i32
    return %c0_i32, %arg1 : i32, i32
  }
  func.func @transform_3(%arg0: i32, %arg1: i32) -> (i32, i32) {
    %c0_i32 = arith.constant 0 : i32
    %c0_i32_0 = arith.constant 0 : i32
    %c0_i32_1 = arith.constant 0 : i32
    return %c0_i32, %c0_i32_0 : i32, i32
  }
  func.func @transform_4(%arg0: i32, %arg1: i32) -> (i32, i32) {
    %c0_i32 = arith.constant 0 : i32
    %c0_i32_0 = arith.constant 0 : i32
    %c0_i32_1 = arith.constant 0 : i32
    return %c0_i32, %c0_i32_0 : i32, i32
  }
  func.func @transform_5(%arg0: i32, %arg1: i32) -> (i32, i32, i32) {
    %c0_i32 = arith.constant 0 : i32
    %c0_i32_0 = arith.constant 0 : i32
    return %arg0, %c0_i32, %arg1 : i32, i32, i32
  }
}

</mosaic_0001>

<bundles_post_ra>
// kernel: tpu_custom_call.1
= control target key start
LH: loop header
LB: loop body
LE: loop exit
PB: predicated region body
PF: predicated region fallthrough
CT: control target
= control target key end

     0   :  { %s4541_s0 = inlined_call_operand.hbm [shape: f32[2,72,256], index: 0, kind: input, shape index: {}]   ;;  %s4542_s1 = inlined_call_operand.hbm [shape: f32[64,72], index: 1, kind: input, shape index: {}]   ;;  %s4543_s2 = inlined_call_operand.hbm [shape: f32[64,256], index: 2, kind: input, shape index: {}]   ;;  %s4544_s3 = inlined_call_operand.vmem [shape: f32[16,32], index: 3, kind: input, shape index: {}]   ;;  %s4545_s4 = inlined_call_operand.vmem [shape: f32[16,1], index: 4, kind: input, shape index: {}]   ;;  %s4546_s5 = inlined_call_operand.hbm [shape: f32[2,16,256], index: 5, kind: output, shape index: {}]  }
   0x1   :  { %4583 = sst [smem:[#allocation34_spill]] %s4542_s1 }
   0x2   :  { %4584 = sst [smem:[#allocation35_spill]] %s4543_s2 }
   0x3   :  { %10 = vsyncpa [#allocation3], 0 }
   0x4   :  { %12 = vsyncpa [#allocation3 + $0x1], 0 }
   0x5   :  { %13 = vsyncpa [#allocation6], 0 }
   0x6   :  { %14 = vsyncpa [#allocation4], 0 }
   0x7   :  { %16 = vsyncpa [#allocation4 + $0x1], 0  ;;  %s3119_s18 = smov 0   ;;  %s3121_s19 = smov 0  }
   0x8   :  { %s3123_s20 = smov 0   ;;  %s3125_s21 = smov 0  }
   0x9   :  { %s3127_s22 = smov 0   ;;  %s3129_s23 = smov 0  }
   0xa LB: > { %s2733_s24 = sadd.s32 4294967295, %s3075_s23   ;;  %s2734_s25 = sadd.s32 4294967294, %s3075_s23   ;;  %s3075_s23 = sphi %s3129_s23, %s22_s23   ;;  %s3071_s22 = sphi %s3127_s22, %s4690_s22   ;;  %s3067_s21 = sphi %s3125_s21, %s4689_s21   ;;  %s3063_s20 = sphi %s3123_s20, %s4688_s20   ;;  %s3059_s19 = sphi %s3121_s19, %s4687_s19   ;;  %s3055_s18 = sphi %s3119_s18, %s4686_s18  }
   0xb   : > { %p56_p0 = scmp.ne.s32.totalorder %s3059_s19, %s3055_s18  ;;  %p3153_p1 = scmp.eq.s32.totalorder %s2733_s24, 0 }
   0xc   : > { %p3157_p2 = scmp.eq.s32.totalorder %s2733_s24, 1  ;;  %p177_p3 = scmp.eq.s32.totalorder %s2734_s25, 1 }
   0xd   : > { %s4585_s26 = scalar_select %p3153_p1, 1, 0 }
   0xe   : > { %p3163_p4 = por %p3153_p1, %p56_p0  ;;  %p2735_p5 = scmp.ge.s32.totalorder %s3075_s23, 1 }
   0xf   : > { %p3168_p6 = por %p177_p3, %p56_p0  ;;  %p184_p7 = scmp.lt.s32.totalorder %s3075_s23, 3 }
  0x10   : > { %s4587_s28 = scalar_select %p3163_p4, 1, 0 }
  0x11   : > { %s4588_s29 = scalar_select %p3168_p6, 1, 0 }
  0x12   : > { %p3173_p8 = pnand %p2735_p5, %p184_p7  ;;  %s3077_s6 = smov [#allocation5]  }
  0x13   : > { %s196_s7 = sshll.u32 %s3077_s6, 4  ;;  %s3078_s9 = smov [#allocation7]   ;;  %s197_s7 = int_to_ptr.vmem [resolvable:$true] %s196_s7 }
  0x14   : > { %p2765_p9 = pneg %p3173_p8  ;;  %s212_s10 = sshll.u32 %s3078_s9, 4  ;;  %s213_s10 = int_to_ptr.vmem [resolvable:$true] %s212_s10 }
  0x15   : > { %s2922_s11 = scalar_lea.vmem %s197_s7, 1024  ;;  %p2930_p5 = scmp.lt.s32.totalorder %s197_s7, %s197_s7 }
  0x16   : > { %p3182_p11 = pnand %p2765_p9, %p3153_p1  ;;  %p2923_p13 = scmp.ne.s32.totalorder %s197_s7, %s2922_s11 }
  0x17   : > { %p2931_p7 = scmp.lt.s32.totalorder %s2922_s11, %s2922_s11 }
  0x18   : > { %p2913_p12 = pneg %p3182_p11 }
  0x19   : > { %p2932_p10 = por %p2931_p7, %p2930_p5 }
  0x1a   : > { %p2925_p0 = pnand %p2923_p13, %p2913_p12 }
  0x1c   : > { %p2926_p3 = pneg %p2925_p0 }
  0x1e   : > { %p2933_p9 = pnand %p2932_p10, %p2926_p3 }
  0x20   : > { %2936 = shalt.err (!%p2933_p9)
}
  0x21   : > { %s3079_s12 = smov 128   ;;  %s3080_s13 = smov 8  }
  0x22   : > { %s4591_s1 = sld [smem:[#allocation34_spill]]  ;;  %s2948_s16 = scalar_lea.vmem %s213_s10, 2048 }
  0x23   : > { %p2949_p6 = scmp.ne.s32.totalorder %s213_s10, %s2948_s16  ;;  %p2956_p1 = scmp.lt.s32.totalorder %s213_s10, %s213_s10 }
  0x24   : > { %p2957_p4 = scmp.lt.s32.totalorder %s2948_s16, %s2948_s16 }
  0x25   : > { %p2951_p13 = pnand %p2949_p6, %p2913_p12 }
  0x26   : > { %p2958_p5 = por %p2957_p4, %p2956_p1 }
  0x27   : > { %p2952_p0 = pneg %p2951_p13 }
  0x28   : > { %2768 = dma.hbm_to_vmem [thread:$0]  (!%p3182_p11), %s4591_s1, 1024, %s197_s7, [#allocation6], %s3079_s12, %s3079_s12, %s3080_s13  }
  0x29   : > { %p2959_p10 = pnand %p2958_p5, %p2952_p0 }
  0x2b   : > { %2962 = shalt.err (!%p2959_p10)
}
  0x2c   : > { %s4550_s17 = smov 256   ;;  %s4551_s24 = smov 16  }
  0x2d   : > { %s4592_s2 = sld [smem:[#allocation35_spill]]  ;;  %s34_s7 = sadd.s32 1, %s3071_s22 }
  0x2e   : > { %s43_s9 = sadd.s32 1, %s3063_s20  ;;  %p36_p1 = scmp.ge.s32.totalorder %s34_s7, 2 }
  0x2f   : > { %p50_p4 = scmp.ne.s32.totalorder %s3063_s20, %s3059_s19  ;;  %p51_p6 = scmp.eq.s32.totalorder %s3075_s23, 0 }
  0x30   : > { %p2782_p12 = scmp.lt.s32.totalorder %s3075_s23, 2  ;;  %s4692_s7 = smov (%p36_p1, %s34_s7), 0 }
  0x31   : > { %p52_p3 = por %p51_p6, %p50_p4  ;;  %p3217_p7 = por %p3157_p2, %p50_p4 }
  0x32   : > { %s38_s11 = ssub.s32 %s3071_s22, %s4692_s7  ;;  %s232_s12 = sand.u32 1, %s3063_s20  }
  0x33   : > { %2771 = dma.hbm_to_vmem [thread:$0]  (!%p3182_p11), %s4592_s2, 2048, %s213_s10, [#allocation6], %s4550_s17, %s4550_s17, %s4551_s24  }
  0x34   : > { %p41_p9 = scmp.eq.s32.totalorder %s38_s11, 0  ;;  %s2750_s10 = smul.u32 144, %s232_s12 }
  0x35   : > { %p3224_p11 = pnand %p2782_p12, %p52_p3  ;;  %s2751_s15 = smul.u32 2304, %s3071_s22 }
  0x36   : > { %s3229_s14 = scalar_select %p41_p9, %s3063_s20, %s43_s9  }
  0x37   : > { %s236_s16 = scalar_lea.vmem [#allocation2], %s2750_s10  ;;  %s244_s17 = scalar_lea.hbm %s4541_s0, %s2751_s15 }
  0x38   : > { %s245_s25 = sshll.u32 %s236_s16, 4  ;;  %s233_s24 = scalar_lea.sflag [#allocation3], %s232_s12  ;;  %s246_s25 = int_to_ptr.vmem [resolvable:$true] %s245_s25 }
  0x39   : > { %p2965_p2 = pneg %p3224_p11  ;;  %s2976_s11 = scalar_lea.vmem %s246_s25, 2304 }
  0x3a   : > { %p2977_p13 = scmp.ne.s32.totalorder %s246_s25, %s2976_s11  ;;  %s3083_s1 = smov [#allocation2]  }
  0x3b   : > { %s2981_s2 = sshll.u32 %s3083_s1, 4  ;;  %s2982_s2 = int_to_ptr.vmem [resolvable:$false] %s2981_s2 }
  0x3c   : > { %p2979_p0 = pnand %p2977_p13, %p2965_p2  ;;  %s2983_s9 = scalar_lea.vmem %s2982_s2, 4608 }
  0x3d   : > { %p2984_p10 = scmp.lt.s32.totalorder %s246_s25, %s2982_s2  ;;  %p2985_p1 = scmp.lt.s32.totalorder %s2983_s9, %s2976_s11 }
  0x3e   : > { %p2980_p5 = pneg %p2979_p0 }
  0x3f   : > { %p2986_p4 = por %p2985_p1, %p2984_p10 }
  0x41   : > { %p2987_p6 = pnand %p2986_p4, %p2980_p5 }
  0x43   : > { %2990 = shalt.err (!%p2987_p6)
}
  0x44   : > { %s4595_s10 = smov 16   ;;  %s4596_s15 = smov 256  }
  0x45   : > { %2775 = dma.hbm_to_vmem [thread:$0]  (!%p3224_p11), %s244_s17, 2304, %s246_s25, %s233_s24, %s4596_s15, %s4596_s15, %s4595_s10  }
  0x46   : > { %257 = sbr.rel (%p3173_p8) target bundleno = 765 (0x2fd), region = 40 }
  0x4b   : > { %s3245_s12 = sand.u32 1, %s3059_s19   ;;  %p4597_p12 = scmp.ne.s32.totalorder %s4587_s28, 0 }
  0x4c   : > { %s2752_s1 = smul.u32 144, %s3245_s12  ;;  %s260_s2 = scalar_lea.sflag [#allocation3], %s3245_s12 }
  0x4e   : > { %s3249_s16 = scalar_lea.vmem [#allocation2], %s2752_s1 }
  0x4f   : > { %3042 = dma.done.wait (%p4597_p12), %s260_s2, 2304  }
  0x50   : > { %3044 = vsyncadd (%p4597_p12), %s260_s2, 4294964992  ;;  %p4598_p3 = scmp.ne.s32.totalorder %s4585_s26, 0 }
  0x52   : > { %3046 = dma.done.wait (%p4598_p3), [#allocation6], 3072  }
  0x53   : > { %3048 = vsyncadd (%p4598_p3), [#allocation6], 4294964224  ;;  %v4571_v0 = vmov 0.0   ;;  %v318_v1 = vld [vmem:[%s3249_s16 + $0x88] sm:$0xff]  ;;  %v317_v2 = vld [vmem:[%s3249_s16 + $0x80] sm:$0xff]  ;;  %vm343_vm0 = vcmask 588800  }
  0x54   : > { %450 = vmatprep.mubr.f32.mxu0 %v4571_v0  ;;  %693 = vmatprep.mubr.f32.mxu1 %v4571_v0  ;;  %v316_v3 = vld [vmem:[%s3249_s16 + $0x78] sm:$0xff]  ;;  %v3264_v4 = vand.u32 4294901760, %v318_v1  ;;  %v3266_v5 = vand.u32 4294901760, %v317_v2  ;;  %v315_v7 = vld [vmem:[%s3249_s16 + $0x70] sm:$0xff]  ;;  %v314_v8 = vld [vmem:[%s3249_s16 + $0x68] sm:$0xff]  ;;  %vm2006_vm1 = vcmask 261120  }
  0x55   : > { %v3268_v6 = vand.u32 4294901760, %v316_v3  ;;  %v313_v9 = vld [vmem:[%s3249_s16 + $0x60] sm:$0xff]  ;;  %v3273_v10 = vand.u32 4294901760, %v315_v7  ;;  %v3275_v11 = vand.u32 4294901760, %v314_v8  ;;  %v312_v13 = vld [vmem:[%s3249_s16 + $0x58] sm:$0xff]  ;;  %v311_v14 = vld [vmem:[%s3249_s16 + $0x50] sm:$0xff] }
  0x56   : > { %v3277_v12 = vand.u32 4294901760, %v313_v9  ;;  %v310_v15 = vld [vmem:[%s3249_s16 + $0x48] sm:$0xff]  ;;  %383 = vmatprep.subr.mxu0 %v3264_v4  ;;  %v3283_v16 = vand.u32 4294901760, %v312_v13  ;;  %v3285_v17 = vand.u32 4294901760, %v311_v14  ;;  %v3290_v19 = vsub.f32 %v318_v1, %v3264_v4  ;;  %v309_v20 = vld [vmem:[%s3249_s16 + $0x40] sm:$0xff]  ;;  %v3294_v21 = vld [vmem:[%s3249_s16 + $0x38] sm:$0xff] }
  0x57   : > { %v3287_v18 = vand.u32 4294901760, %v310_v15  ;;  %v3297_v22 = vld [vmem:[%s3249_s16 + $0x30] sm:$0xff]  ;;  %385 = vmatpush1.msra.mxu0 %v3266_v5  ;;  %v3300_v23 = vand.u32 4294901760, %v309_v20  ;;  %v3303_v24 = vsub.f32 %v317_v2, %v3266_v5  ;;  %v3306_v25 = vand.u32 4294901760, %v3294_v21  ;;  %v3312_v27 = vld [vmem:[%s3249_s16 + $0x28] sm:$0xff]  ;;  %v3315_v28 = vld [vmem:[%s3249_s16 + $0x20] sm:$0xff] }
  0x58   : > { %v3309_v26 = vsub.f32 %v316_v3, %v3268_v6  ;;  %v3318_v29 = vld [vmem:[%s3249_s16 + $0x18] sm:$0xff]  ;;  %387 = vmatprep.subr.mxu0 %v3268_v6  ;;  %v555_v30 = vand.u32 4294901760, %v3290_v19  ;;  %v3323_v31 = vand.u32 4294901760, %v3297_v22  ;;  %v3326_v32 = vsub.f32 %v315_v7, %v3273_v10  ;;  %v3341_v38 = vld [vmem:[%s3249_s16 + $0x10] sm:$0xff]  ;;  %v3366_v47 = vld [vmem:[%s3249_s16 + $0x8] sm:$0xff]  ;;  %s2743_s27 = sshll.u32 %s3245_s12, 5 }
  0x59   : > { %v3329_v33 = vand.u32 4294901760, %v3312_v27  ;;  %389 = vmatpush1.msra.mxu0 %v3273_v10  ;;  %v4568_v34 = vand.u32 4294901760, %v3303_v24  ;;  %v3335_v36 = vsub.f32 %v314_v8, %v3275_v11  ;;  %v3338_v37 = vand.u32 4294901760, %v3315_v28  ;;  %v3377_v52 = vld [vmem:[%s3249_s16] sm:$0xff]  ;;  %s297_s11 = scalar_lea.vmem [#allocation8], %s2743_s27  ;;  %s2749_s10 = sshll.u32 %s3067_s21, 9 }
  0x5a   : > { %v4567_v35 = vand.u32 4294901760, %v3309_v26  ;;  %391 = vmatprep.subr.mxu0 %v3275_v11  ;;  %v556_v39 = vsub.f32 %v3290_v19, %v555_v30  ;;  %v4564_v40 = vand.u32 4294901760, %v3326_v32  ;;  %v3349_v41 = vsub.f32 %v313_v9, %v3277_v12  ;;  %v319_v57 = vld [vmem:[#allocation5] sm:$0xff]  ;;  %s2625_s9 = sshll.u32 %s297_s11, 4  ;;  %s4493_s2 = scalar_lea.hbm %s4546_s5, %s2749_s10  ;;  %s4488_s9 = int_to_ptr.vmem [resolvable:$true] %s2625_s9 }
  0x5b   : > { %v3352_v42 = vand.u32 4294901760, %v3318_v29  ;;  %393 = vmatpush1.msra.mxu0 %v3277_v12  ;;  %v562_v43 = vsub.f32 %v3303_v24, %v4568_v34  ;;  %v4563_v45 = vand.u32 4294901760, %v3335_v36  ;;  %v3363_v46 = vsub.f32 %v312_v13, %v3283_v16  ;;  %s2991_s21 = scalar_lea.vmem %s4488_s9, 512  ;;  %s3086_s26 = smov [#allocation8]  }
  0x5c   : > { %v568_v44 = vsub.f32 %v3309_v26, %v4567_v35  ;;  %395 = vmatprep.subr.mxu0 %v3283_v16  ;;  %v557_v48 = vand.u32 4294901760, %v556_v39  ;;  %v574_v49 = vsub.f32 %v3326_v32, %v4564_v40  ;;  %v4562_v50 = vand.u32 4294901760, %v3349_v41  ;;  %p2992_p8 = scmp.ne.s32.totalorder %s4488_s9, %s2991_s21  ;;  %s2995_s28 = sshll.u32 %s3086_s26, 4  ;;  %s2996_s28 = int_to_ptr.vmem [resolvable:$false] %s2995_s28 }
  0x5d   : > { %v3374_v51 = vand.u32 4294901760, %v3341_v38  ;;  %397 = vmatpush1.msra.mxu0 %v3285_v17  ;;  %v563_v53 = vand.u32 4294901760, %v562_v43  ;;  %v580_v55 = vsub.f32 %v3335_v36, %v4563_v45  ;;  %v4561_v56 = vand.u32 4294901760, %v3363_v46  ;;  %s2997_s30 = scalar_lea.vmem %s2996_s28, 1024  ;;  %p2998_p2 = scmp.lt.s32.totalorder %s4488_s9, %s2996_s28 }
  0x5e   : > { %v569_v54 = vand.u32 4294901760, %v568_v44  ;;  %399 = vmatprep.subr.mxu0 %v3287_v18  ;;  %558 = vmatprep.subr.mxu1 %v557_v48  ;;  %v575_v58 = vand.u32 4294901760, %v574_v49  ;;  %v586_v59 = vsub.f32 %v3349_v41, %v4562_v50  ;;  %v3389_v60 = vsub.f32 %v311_v14, %v3285_v17  ;;  %p2993_p9 = pnand %p2992_p8, %p3217_p7  ;;  %p2999_p13 = scmp.lt.s32.totalorder %s2997_s30, %s2991_s21 }
  0x5f   : > { %v3392_v61 = vand.u32 4294901760, %v3366_v47  ;;  %401 = vmatpush1.msra.mxu0 %v3300_v23  ;;  %564 = vmatpush1.msra.mxu1 %v563_v53  ;;  %v581_v62 = vand.u32 4294901760, %v580_v55  ;;  %v592_v63 = vsub.f32 %v3363_v46, %v4561_v56  ;;  %v3399_v1 = vsub.f32 %v310_v15, %v3287_v18  ;;  %v325_v56 = vld [vmem:[#allocation5 + $0x30] sm:$0xff] }
  0x60   : > { %v3402_v2 = vand.u32 4294901760, %v3377_v52  ;;  %403 = vmatprep.subr.mxu0 %v3306_v25  ;;  %570 = vmatprep.subr.mxu1 %v569_v54  ;;  %v587_v3 = vand.u32 4294901760, %v586_v59  ;;  %v4558_v7 = vand.u32 4294901760, %v3389_v60  ;;  %v3407_v8 = vsub.f32 %v309_v20, %v3300_v23  ;;  %v320_v54 = vld [vmem:[#allocation5 + $0x8] sm:$0xff]  ;;  %p2994_p11 = pneg %p2993_p9  ;;  %p3000_p0 = por %p2999_p13, %p2998_p2 }
  0x61   : > { %v345_v9 = vsel %vm343_vm0, %v319_v57, 0  ;;  %405 = vmatpush1.msra.mxu0 %v3323_v31  ;;  %576 = vmatpush1.msra.mxu1 %v575_v58  ;;  %v593_v13 = vand.u32 4294901760, %v592_v63  ;;  %v4556_v14 = vand.u32 4294901760, %v3399_v1  ;;  %v3416_v39 = vsub.f32 %v3294_v21, %v3306_v25 }
  0x62   : > { %v3412_v15 = vand.u32 4294901760, %v345_v9  ;;  %407 = vmatprep.subr.mxu0 %v3329_v33  ;;  %582 = vmatprep.subr.mxu1 %v581_v62  ;;  %v598_v20 = vsub.f32 %v3389_v60, %v4558_v7  ;;  %v4554_v43 = vand.u32 4294901760, %v3407_v8  ;;  %v3425_v44 = vsub.f32 %v3297_v22, %v3323_v31  ;;  %p3001_p5 = pnand %p3000_p0, %p2994_p11 }
  0x63   : > { %v3429_v48 = vsub.f32 %v3312_v27, %v3329_v33  ;;  %409 = vmatpush1.msra.mxu0 %v3338_v37  ;;  %588 = vmatpush1.msra.mxu1 %v587_v3  ;;  %v604_v21 = vsub.f32 %v3399_v1, %v4556_v14  ;;  %v4552_v53 = vand.u32 4294901760, %v3416_v39  ;;  %v3441_v22 = vsub.f32 %v3315_v28, %v3338_v37  ;;  %v322_v14 = vld [vmem:[#allocation5 + $0x18] sm:$0xff] }
  0x64   : > { %v3436_v49 = vsub.f32 %v345_v9, %v3412_v15  ;;  %411 = vmatprep.subr.mxu0 %v3352_v42  ;;  %594 = vmatprep.subr.mxu1 %v593_v13  ;;  %v599_v27 = vand.u32 4294901760, %v598_v20  ;;  %v610_v55 = vsub.f32 %v3407_v8, %v4554_v43  ;;  %v4553_v57 = vand.u32 4294901760, %v3425_v44 }
  0x65   : > { %v4555_v58 = vand.u32 4294901760, %v3429_v48  ;;  %413 = vmatpush1.msra.mxu0 %v3374_v51  ;;  %v605_v59 = vand.u32 4294901760, %v604_v21  ;;  %v616_v28 = vsub.f32 %v3416_v39, %v4552_v53  ;;  %v4557_v63 = vand.u32 4294901760, %v3441_v22 }
  0x66   : > { %v4570_v62 = vand.u32 4294901760, %v3436_v49  ;;  %600 = vmatpush1.msra.mxu1 %v599_v27  ;;  %415 = vmatprep.subr.mxu0 %v3392_v61  ;;  %v611_v3 = vand.u32 4294901760, %v610_v55  ;;  %v622_v9 = vsub.f32 %v3425_v44, %v4553_v57  ;;  %v348_v20 = vsel %vm343_vm0, %v320_v54, 0  ;;  %v321_v57 = vld [vmem:[#allocation5 + $0x10] sm:$0xff] }
  0x67   : > { %v628_v13 = vsub.f32 %v3429_v48, %v4555_v58  ;;  %606 = vmatprep.subr.mxu1 %v605_v59  ;;  %417 = vmatpush1.msra.mxu0 %v3402_v2  ;;  %v617_v27 = vand.u32 4294901760, %v616_v28  ;;  %v634_v55 = vsub.f32 %v3441_v22, %v4557_v63  ;;  %v3470_v53 = vand.u32 4294901760, %v348_v20 }
  0x68   : > { %v454_v21 = vsub.f32 %v3436_v49, %v4570_v62  ;;  %612 = vmatpush1.msra.mxu1 %v611_v3  ;;  %v623_v43 = vand.u32 4294901760, %v622_v9  ;;  %v3474_v54 = vsub.f32 %v3318_v29, %v3352_v42  ;;  %v3478_v59 = vsub.f32 %v3341_v38, %v3374_v51  ;;  %766 = vmatprep.subr.mxu0 %v3290_v19 }
  0x69   : > { %v629_v58 = vand.u32 4294901760, %v628_v13  ;;  %618 = vmatprep.subr.mxu1 %v617_v27  ;;  %v635_v63 = vand.u32 4294901760, %v634_v55  ;;  %v3482_v7 = vsub.f32 %v348_v20, %v3470_v53  ;;  %v3486_v3 = vsub.f32 %v3366_v47, %v3392_v61 }
  0x6a   : > { %v455_v28 = vand.u32 4294901760, %v454_v21  ;;  %624 = vmatpush1.msra.mxu1 %v623_v43  ;;  %v4559_v29 = vand.u32 4294901760, %v3474_v54  ;;  %v4560_v9 = vand.u32 4294901760, %v3478_v59  ;;  %v3492_v38 = vsub.f32 %v3377_v52, %v3402_v2  ;;  %v323_v21 = vld [vmem:[#allocation5 + $0x20] sm:$0xff] }
  0x6b   : > { %v351_v13 = vsel %vm343_vm0, %v321_v57, 0  ;;  %630 = vmatprep.subr.mxu1 %v629_v58  ;;  %v4565_v20 = vand.u32 4294901760, %v3482_v7  ;;  %v4566_v27 = vand.u32 4294901760, %v3486_v3  ;;  %v354_v43 = vsel %vm343_vm0, %v322_v14, 0 }
  0x6c   : > { %456 = vmatmul.mubr.f32.vlgmr.msra.gmra.mxu0 %v455_v28  ;;  %v3497_v47 = vand.u32 4294901760, %v351_v13  ;;  %636 = vmatpush1.msra.mxu1 %v635_v63  ;;  %v640_v52 = vsub.f32 %v3474_v54, %v4559_v29  ;;  %v646_v57 = vsub.f32 %v3478_v59, %v4560_v9  ;;  %v4569_v58 = vand.u32 4294901760, %v3492_v38  ;;  %v324_v9 = vld [vmem:[#allocation5 + $0x28] sm:$0xff] }
  0x6d   : > { %461 = vmatprep.mubr.f32.mxu0 %v4571_v0  ;;  %v3508_v55 = vand.u32 4294901760, %v354_v43  ;;  %v465_v28 = vsub.f32 %v3482_v7, %v4565_v20  ;;  %v652_v14 = vsub.f32 %v3486_v3, %v4566_v27  ;;  %769 = vmatpush1.msra.mxu0 %v3303_v24  ;;  %v357_v29 = vsel %vm343_vm0, %v323_v21, 0  ;;  %v326_v21 = vld [vmem:[#allocation5 + $0x38] sm:$0xff] }
  0x6e   : > { %v3517_v63 = vsub.f32 %v351_v13, %v3497_v47  ;;  %v641_v50 = vand.u32 4294901760, %v640_v52  ;;  %v647_v45 = vand.u32 4294901760, %v646_v57  ;;  %v658_v40 = vsub.f32 %v3492_v38, %v4569_v58  ;;  %772 = vmatprep.subr.mxu0 %v3309_v26 }
  0x6f   : > { %v3525_v20 = vsub.f32 %v354_v43, %v3508_v55  ;;  %v466_v27 = vand.u32 4294901760, %v465_v28  ;;  %v653_v13 = vand.u32 4294901760, %v652_v14  ;;  %v3529_v34 = vand.u32 4294901760, %v357_v29  ;;  %775 = vmatpush1.msra.mxu0 %v3326_v32 }
  0x70   : > { %v475_v35 = vand.u32 4294901760, %v3517_v63  ;;  %642 = vmatprep.subr.mxu1 %v641_v50  ;;  %v659_v52 = vand.u32 4294901760, %v658_v40  ;;  %778 = vmatprep.subr.mxu0 %v3335_v36  ;;  %v360_v43 = vsel %vm343_vm0, %v324_v9, 0  ;;  %v363_v58 = vsel %vm343_vm0, %v325_v56, 0 }
  0x71   : > { %v486_v57 = vand.u32 4294901760, %v3525_v20  ;;  %467 = vmatmul.mubr.f32.gmra.mxu0 %v466_v27  ;;  %648 = vmatpush1.msra.mxu1 %v647_v45  ;;  %v3540_v14 = vsub.f32 %v357_v29, %v3529_v34  ;;  %v3542_v62 = vand.u32 4294901760, %v360_v43  ;;  %v3544_v40 = vand.u32 4294901760, %v363_v58 }
  0x72   : > { %v476_v28 = vsub.f32 %v3517_v63, %v475_v35  ;;  %654 = vmatprep.subr.mxu1 %v653_v13  ;;  %472 = vmatprep.mubr.f32.mxu0 %v4571_v0  ;;  %v366_v45 = vsel %vm343_vm0, %v326_v21, 0  ;;  %v4599_v19 = vand.u32 4294901760, %v3436_v49 }
  0x73   : > { %v487_v50 = vsub.f32 %v3525_v20, %v486_v57  ;;  %660 = vmatpush1.msra.mxu1 %v659_v52  ;;  %v497_v9 = vand.u32 4294901760, %v3540_v14  ;;  %781 = vmatpush1.msra.mxu0 %v3349_v41  ;;  %v3554_v29 = vsub.f32 %v360_v43, %v3542_v62  ;;  %v3559_v27 = vsub.f32 %v363_v58, %v3544_v40 }
  0x74   : > { %v477_v56 = vand.u32 4294901760, %v476_v28  ;;  %695 = vmatmul.mubr.f32.vlgmr.msra.gmra.mxu1 %v3412_v15  ;;  %784 = vmatprep.subr.mxu0 %v3363_v46  ;;  %v3566_v28 = vand.u32 4294901760, %v366_v45 }
  0x75   : > { %700 = vmatprep.mubr.f32.mxu1 %v4571_v0  ;;  %v488_v13 = vand.u32 4294901760, %v487_v50  ;;  %v498_v21 = vsub.f32 %v3540_v14, %v497_v9  ;;  %v508_v52 = vand.u32 4294901760, %v3554_v29  ;;  %787 = vmatpush1.msra.mxu0 %v3389_v60  ;;  %v519_v50 = vand.u32 4294901760, %v3559_v27 }
  0x76   : > { %478 = vmatmul.mubr.f32.gmra.mxu0 %v477_v56  ;;  %790 = vmatprep.subr.mxu0 %v3399_v1  ;;  %v3580_v56 = vsub.f32 %v366_v45, %v3566_v28 }
  0x77   : > { %483 = vmatprep.mubr.f32.mxu0 %v4571_v0  ;;  %930 = vmatprep.subr.mxu1 %v3264_v4  ;;  %v499_v58 = vand.u32 4294901760, %v498_v21  ;;  %v509_v43 = vsub.f32 %v3554_v29, %v508_v52  ;;  %v520_v45 = vsub.f32 %v3559_v27, %v519_v50 }
  0x78   : > { %702 = vmatmul.mubr.f32.gmra.mxu1 %v3470_v53  ;;  %793 = vmatpush1.msra.mxu0 %v3407_v8  ;;  %v530_v21 = vand.u32 4294901760, %v3580_v56 }
  0x79   : > { %707 = vmatprep.mubr.f32.mxu1 %v4571_v0  ;;  %932 = vmatpush1.msra.mxu1 %v3266_v5 }
  0x7a   : > { %489 = vmatmul.mubr.f32.gmra.mxu0 %v488_v13  ;;  %796 = vmatprep.subr.mxu0 %v3416_v39  ;;  %v510_v13 = vand.u32 4294901760, %v509_v43  ;;  %v531_v43 = vsub.f32 %v3580_v56, %v530_v21 }
  0x7b   : > { %494 = vmatprep.mubr.f32.mxu0 %v4571_v0  ;;  %934 = vmatprep.subr.mxu1 %v3268_v6 }
  0x7c   : > { %709 = vmatmul.mubr.f32.gmra.mxu1 %v3497_v47  ;;  %799 = vmatpush1.msra.mxu0 %v3425_v44 }
  0x7d   : > { %714 = vmatprep.mubr.f32.mxu1 %v4571_v0  ;;  %936 = vmatpush1.msra.mxu1 %v3273_v10 }
  0x7e   : > { %500 = vmatmul.mubr.f32.gmra.mxu0 %v499_v58  ;;  %802 = vmatprep.subr.mxu0 %v3429_v48  ;;  %v521_v58 = vand.u32 4294901760, %v520_v45  ;;  %v4601_v45 = vand.u32 4294901760, %v3309_v26  ;;  %v4605_v26 = vand.u32 4294901760, %v3349_v41  ;;  %v4609_v41 = vand.u32 4294901760, %v3407_v8 }
  0x7f   : > { %505 = vmatprep.mubr.f32.mxu0 %v4571_v0  ;;  %938 = vmatprep.subr.mxu1 %v3275_v11 }
  0x80   : > { %716 = vmatmul.mubr.f32.gmra.mxu1 %v3508_v55  ;;  %805 = vmatpush1.msra.mxu0 %v3441_v22 }
  0x81   : > { %721 = vmatprep.mubr.f32.mxu1 %v4571_v0  ;;  %940 = vmatpush1.msra.mxu1 %v3277_v12 }
  0x82   : > { %511 = vmatmul.mubr.f32.gmra.mxu0 %v510_v13  ;;  %808 = vmatprep.subr.mxu0 %v3474_v54  ;;  %v532_v13 = vand.u32 4294901760, %v531_v43 }
  0x83   : > { %516 = vmatprep.mubr.f32.mxu0 %v4571_v0  ;;  %942 = vmatprep.subr.mxu1 %v3283_v16 }
  0x84   : > { %723 = vmatmul.mubr.f32.gmra.mxu1 %v3529_v34  ;;  %811 = vmatpush1.msra.mxu0 %v3478_v59 }
  0x85   : > { %728 = vmatprep.mubr.f32.mxu1 %v4571_v0  ;;  %944 = vmatpush1.msra.mxu1 %v3285_v17 }
  0x86   : > { %522 = vmatmul.mubr.f32.gmra.mxu0 %v521_v58  ;;  %814 = vmatprep.subr.mxu0 %v3486_v3  ;;  %v4602_v58 = vand.u32 4294901760, %v3326_v32  ;;  %v4606_v32 = vand.u32 4294901760, %v3363_v46  ;;  %v4612_v46 = vand.u32 4294901760, %v3429_v48 }
  0x87   : > { %527 = vmatprep.mubr.f32.mxu0 %v4571_v0  ;;  %946 = vmatprep.subr.mxu1 %v3287_v18 }
  0x88   : > { %730 = vmatmul.mubr.f32.gmra.mxu1 %v3542_v62  ;;  %817 = vmatpush1.msra.mxu0 %v3492_v38 }
  0x89   : > { %735 = vmatprep.mubr.f32.mxu1 %v4571_v0  ;;  %948 = vmatpush1.msra.mxu1 %v3300_v23 }
  0x8a   : > { %533 = vmatmul.mubr.f32.gmra.mxu0 %v532_v13  ;;  %950 = vmatprep.subr.mxu1 %v3306_v25  ;;  %v336_v13 = vld [vmem:[#allocation7 + $0x48] sm:$0xff] }
  0x8b   : > { %850 = vmatprep.mubr.f32.mxu0 %v4571_v0  ;;  %1087 = vmatprep.subr.mxu0 %v555_v30  ;;  %v4600_v30 = vand.u32 4294901760, %v3303_v24  ;;  %v4604_v24 = vand.u32 4294901760, %v3335_v36  ;;  %v4608_v36 = vand.u32 4294901760, %v3399_v1 }
  0x8c   : > { %737 = vmatmul.mubr.f32.gmra.mxu1 %v3544_v40 }
  0x8d   : > { %952 = vmatpush1.msra.mxu1 %v3323_v31  ;;  %742 = vmatprep.mubr.f32.mxu1 %v4571_v0 }
  0x8e   : > { %853 = vmatmul.mubr.f32.vlgmr.msra.gmra.mxu0 %v3436_v49  ;;  %954 = vmatprep.subr.mxu1 %v3329_v33  ;;  %v4603_v49 = vand.u32 4294901760, %v3482_v7 }
  0x8f   : > { %858 = vmatprep.mubr.f32.mxu0 %v4571_v0  ;;  %956 = vmatpush1.msra.mxu1 %v3338_v37 }
  0x90   : > { %744 = vmatmul.mubr.f32.gmra.mxu1 %v3566_v28  ;;  %958 = vmatprep.subr.mxu1 %v3352_v42 }
  0x91   : > { %960 = vmatpush1.msra.mxu1 %v3374_v51  ;;  %997 = vmatprep.mubr.f32.mxu1 %v4571_v0 }
  0x92   : > { %861 = vmatmul.mubr.f32.gmra.mxu0 %v3482_v7  ;;  %962 = vmatprep.subr.mxu1 %v3392_v61  ;;  %v331_v7 = vld [vmem:[#allocation7 + $0x20] sm:$0xff] }
  0x93   : > { %866 = vmatprep.mubr.f32.mxu0 %v4571_v0  ;;  %964 = vmatpush1.msra.mxu1 %v3402_v2 }
  0x94   : > { %1001 = vmatmul.mubr.f32.vlgmr.msra.gmra.mxu1 %v4599_v19  ;;  %1091 = vmatpush1.msra.mxu0 %v4600_v30  ;;  %v337_v19 = vld [vmem:[#allocation7 + $0x50] sm:$0xff] }
  0x95   : > { %1006 = vmatprep.mubr.f32.mxu1 %v4571_v0  ;;  %1095 = vmatprep.subr.mxu0 %v4601_v45 }
  0x96   : > { %869 = vmatmul.mubr.f32.gmra.mxu0 %v3517_v63  ;;  %1260 = vmatprep.subr.mxu1 %v3264_v4  ;;  %v4607_v4 = vand.u32 4294901760, %v3389_v60  ;;  %v4616_v60 = vand.u32 4294901760, %v3486_v3 }
  0x97   : > { %874 = vmatprep.mubr.f32.mxu0 %v4571_v0  ;;  %1099 = vmatpush1.msra.mxu0 %v4602_v58 }
  0x98   : > { %1010 = vmatmul.mubr.f32.gmra.mxu1 %v4603_v49  ;;  %1103 = vmatprep.subr.mxu0 %v4604_v24 }
  0x99   : > { %1015 = vmatprep.mubr.f32.mxu1 %v4571_v0  ;;  %1107 = vmatpush1.msra.mxu0 %v4605_v26 }
  0x9a   : > { %877 = vmatmul.mubr.f32.gmra.mxu0 %v3525_v20  ;;  %1111 = vmatprep.subr.mxu0 %v4606_v32 }
  0x9b   : > { %882 = vmatprep.mubr.f32.mxu0 %v4571_v0  ;;  %1262 = vmatpush1.msra.mxu1 %v3266_v5  ;;  %v4610_v5 = vand.u32 4294901760, %v3416_v39 }
  0x9c   : > { %1019 = vmatmul.mubr.f32.gmra.mxu1 %v475_v35  ;;  %1115 = vmatpush1.msra.mxu0 %v4607_v4  ;;  %v4611_v35 = vand.u32 4294901760, %v3425_v44 }
  0x9d   : > { %1024 = vmatprep.mubr.f32.mxu1 %v4571_v0  ;;  %1119 = vmatprep.subr.mxu0 %v4608_v36  ;;  %v338_v36 = vld [vmem:[#allocation7 + $0x58] sm:$0xff] }
  0x9e   : > { %885 = vmatmul.mubr.f32.gmra.mxu0 %v3540_v14  ;;  %1264 = vmatprep.subr.mxu1 %v3268_v6  ;;  %v4613_v6 = vand.u32 4294901760, %v3441_v22 }
  0x9f   : > { %890 = vmatprep.mubr.f32.mxu0 %v4571_v0  ;;  %1123 = vmatpush1.msra.mxu0 %v4609_v41 }
  0xa0   : > { %1028 = vmatmul.mubr.f32.gmra.mxu1 %v486_v57  ;;  %1127 = vmatprep.subr.mxu0 %v4610_v5 }
  0xa1   : > { %1033 = vmatprep.mubr.f32.mxu1 %v4571_v0  ;;  %1131 = vmatpush1.msra.mxu0 %v4611_v35 }
  0xa2   : > { %893 = vmatmul.mubr.f32.gmra.mxu0 %v3554_v29  ;;  %1266 = vmatpush1.msra.mxu1 %v3273_v10  ;;  %v4614_v10 = vand.u32 4294901760, %v3474_v54  ;;  %v332_v54 = vld [vmem:[#allocation7 + $0x28] sm:$0xff] }
  0xa3   : > { %898 = vmatprep.mubr.f32.mxu0 %v4571_v0  ;;  %1135 = vmatprep.subr.mxu0 %v4612_v46 }
  0xa4   : > { %1037 = vmatmul.mubr.f32.gmra.mxu1 %v497_v9  ;;  %1268 = vmatprep.subr.mxu1 %v3275_v11  ;;  %v4615_v11 = vand.u32 4294901760, %v3478_v59  ;;  %v333_v59 = vld [vmem:[#allocation7 + $0x30] sm:$0xff]  ;;  %v335_v9 = vld [vmem:[#allocation7 + $0x40] sm:$0xff] }
  0xa5   : > { %1042 = vmatprep.mubr.f32.mxu1 %v4571_v0  ;;  %1139 = vmatpush1.msra.mxu0 %v4613_v6 }
  0xa6   : > { %901 = vmatmul.mubr.f32.gmra.mxu0 %v3559_v27  ;;  %1270 = vmatpush1.msra.mxu1 %v3277_v12  ;;  %v4617_v12 = vand.u32 4294901760, %v3492_v38 }
  0xa7   : > { %906 = vmatprep.mubr.f32.mxu0 %v4571_v0  ;;  %1143 = vmatprep.subr.mxu0 %v4614_v10 }
  0xa8   : > { %1046 = vmatmul.mubr.f32.gmra.mxu1 %v508_v52  ;;  %1272 = vmatprep.subr.mxu1 %v3283_v16 }
  0xa9   : > { %1274 = vmatpush1.msra.mxu1 %v3285_v17  ;;  %1147 = vmatpush1.msra.mxu0 %v4615_v11 }
  0xaa   : > { %909 = vmatmul.mubr.f32.gmra.mxu0 %v3580_v56  ;;  %1276 = vmatprep.subr.mxu1 %v3287_v18  ;;  %v327_v18 = vld [vmem:[#allocation7] sm:$0xff] }
  0xab   : > { %1151 = vmatprep.subr.mxu0 %v4616_v60  ;;  %1051 = vmatprep.mubr.f32.mxu1 %v4571_v0 }
  0xac   : > { %1155 = vmatpush1.msra.mxu0 %v4617_v12  ;;  %1188 = vmatprep.mubr.f32.mxu0 %v4571_v0 }
  0xad   : > { %1278 = vmatpush1.msra.mxu1 %v3300_v23 }
  0xae   : > { %1190 = vmatmul.mubr.f32.vlgmr.msra.gmra.mxu0 %v3412_v15  ;;  %1055 = vmatmul.mubr.f32.gmra.mxu1 %v519_v50 }
  0xaf   : > { %1280 = vmatprep.subr.mxu1 %v3306_v25  ;;  %1060 = vmatprep.mubr.f32.mxu1 %v4571_v0 }
  0xb0   : > { %1282 = vmatpush1.msra.mxu1 %v3323_v31  ;;  %1195 = vmatprep.mubr.f32.mxu0 %v4571_v0  ;;  %v328_v31 = vld [vmem:[#allocation7 + $0x8] sm:$0xff] }
  0xb1   : > { %1284 = vmatprep.subr.mxu1 %v3329_v33  ;;  %v329_v33 = vld [vmem:[#allocation7 + $0x10] sm:$0xff] }
  0xb2   : > { %1286 = vmatpush1.msra.mxu1 %v3338_v37  ;;  %1197 = vmatmul.mubr.f32.gmra.mxu0 %v3470_v53 }
  0xb3   : > { %1064 = vmatmul.mubr.f32.gmra.mxu1 %v530_v21  ;;  %1288 = vmatprep.subr.mxu1 %v3352_v42 }
  0xb4   : > { %1290 = vmatpush1.msra.mxu1 %v3374_v51  ;;  %1202 = vmatprep.mubr.f32.mxu0 %v4571_v0 }
  0xb5   : > { %1292 = vmatprep.subr.mxu1 %v3392_v61  ;;  %1327 = vmatprep.mubr.f32.mxu1 %v4571_v0 }
  0xb6   : > { %1294 = vmatpush1.msra.mxu1 %v3402_v2  ;;  %1204 = vmatmul.mubr.f32.gmra.mxu0 %v3497_v47  ;;  %v330_v2 = vld [vmem:[#allocation7 + $0x18] sm:$0xff] }
  0xb7   : > { %1329 = vmatmul.mubr.f32.vlgmr.msra.gmra.mxu1 %v3412_v15  ;;  %1209 = vmatprep.mubr.f32.mxu0 %v4571_v0 }
  0xb8   : > { %1334 = vmatprep.mubr.f32.mxu1 %v4571_v0 }
  0xba   : > { %1211 = vmatmul.mubr.f32.gmra.mxu0 %v3508_v55 }
  0xbb   : > { %1336 = vmatmul.mubr.f32.gmra.mxu1 %v3470_v53  ;;  %1216 = vmatprep.mubr.f32.mxu0 %v4571_v0 }
  0xbc   : > { %1341 = vmatprep.mubr.f32.mxu1 %v4571_v0 }
  0xbe   : > { %1218 = vmatmul.mubr.f32.gmra.mxu0 %v3529_v34 }
  0xbf   : > { %1343 = vmatmul.mubr.f32.gmra.mxu1 %v3497_v47  ;;  %1223 = vmatprep.mubr.f32.mxu0 %v4571_v0 }
  0xc0   : > { %1348 = vmatprep.mubr.f32.mxu1 %v4571_v0 }
  0xc2   : > { %1225 = vmatmul.mubr.f32.gmra.mxu0 %v3542_v62 }
  0xc3   : > { %1350 = vmatmul.mubr.f32.gmra.mxu1 %v3508_v55  ;;  %1230 = vmatprep.mubr.f32.mxu0 %v4571_v0 }
  0xc4   : > { %1355 = vmatprep.mubr.f32.mxu1 %v4571_v0 }
  0xc6   : > { %1232 = vmatmul.mubr.f32.gmra.mxu0 %v3544_v40 }
  0xc7   : > { %1357 = vmatmul.mubr.f32.gmra.mxu1 %v3529_v34  ;;  %1237 = vmatprep.mubr.f32.mxu0 %v4571_v0 }
  0xc8   : > { %1362 = vmatprep.mubr.f32.mxu1 %v4571_v0 }
  0xca   : > { %1239 = vmatmul.mubr.f32.gmra.mxu0 %v3566_v28 }
  0xcb   : > { %1364 = vmatmul.mubr.f32.gmra.mxu1 %v3542_v62  ;;  %2085 = vmatprep.mubr.f32.mxu0 %v4571_v0 }
  0xcc   : > { %1369 = vmatprep.mubr.f32.mxu1 %v4571_v0 }
  0xcf   : > { %1371 = vmatmul.mubr.f32.gmra.mxu1 %v3544_v40  ;;  %v334_v40 = vld [vmem:[#allocation7 + $0x38] sm:$0xff] }
  0xd0   : > { %1376 = vmatprep.mubr.f32.mxu1 %v4571_v0 }
  0xd3   : > { %1378 = vmatmul.mubr.f32.gmra.mxu1 %v3566_v28 }
  0xd4   : > { %2212 = vmatprep.mubr.f32.mxu1 %v4571_v0 }
 0x12c   : > { %v457_v16 = vpop.f32.mrf.mxu0 }
 0x12d   : > { %v458_v23 = vadd.f32 %v457_v16, %v327_v18 }
 0x12e   : > { %v459_v17 = vpop.f32.mrf.mxu0 }
 0x12f   : > { %v460_v42 = vadd.f32 %v459_v17, %v328_v31 }
 0x131   : > { %v468_v25 = vpop.f32.mrf.mxu0 }
 0x132   : > { %v469_v51 = vadd.f32 %v468_v25, %v329_v33 }
 0x133   : > { %v470_v34 = vpop.f32.mrf.mxu0 }
 0x134   : > { %v696_v37 = vpop.f32.mrf.mxu1  ;;  %v471_v48 = vadd.f32 %v470_v34, %v330_v2 }
 0x135   : > { %v697_v1 = vadd.f32 %v696_v37, %v458_v23 }
 0x136   : > { %v479_v61 = vpop.f32.mrf.mxu0  ;;  %v698_v8 = vpop.f32.mrf.mxu1 }
 0x137   : > { %v699_v39 = vadd.f32 %v698_v8, %v460_v42  ;;  %v480_v53 = vadd.f32 %v479_v61, %v331_v7 }
 0x138   : > { %v481_v15 = vpop.f32.mrf.mxu0  ;;  %v703_v44 = vpop.f32.mrf.mxu1 }
 0x139   : > { %v704_v62 = vadd.f32 %v703_v44, %v469_v51  ;;  %v482_v55 = vadd.f32 %v481_v15, %v332_v54 }
 0x13a   : > { %v490_v22 = vpop.f32.mrf.mxu0  ;;  %v705_v3 = vpop.f32.mrf.mxu1 }
 0x13b   : > { %v706_v20 = vadd.f32 %v705_v3, %v471_v48  ;;  %v491_v63 = vadd.f32 %v490_v22, %v333_v59 }
 0x13c   : > { %v492_v38 = vpop.f32.mrf.mxu0  ;;  %v710_v47 = vpop.f32.mrf.mxu1 }
 0x13d   : > { %v3757_v14 = vadd.f32 %v710_v47, %v480_v53  ;;  %v493_v50 = vadd.f32 %v492_v38, %v334_v40 }
 0x13e   : > { %v501_v57 = vpop.f32.mrf.mxu0  ;;  %v712_v29 = vpop.f32.mrf.mxu1 }
 0x13f   : > { %v3759_v52 = vadd.f32 %v712_v29, %v482_v55  ;;  %v502_v56 = vadd.f32 %v501_v57, %v335_v9 }
 0x140   : > { %v503_v27 = vpop.f32.mrf.mxu0  ;;  %v717_v28 = vpop.f32.mrf.mxu1 }
 0x141   : > { %v3761_v43 = vadd.f32 %v717_v28, %v491_v63  ;;  %v504_v24 = vadd.f32 %v503_v27, %v336_v13 }
 0x142   : > { %v512_v21 = vpop.f32.mrf.mxu0  ;;  %v719_v30 = vpop.f32.mrf.mxu1 }
 0x143   : > { %v3763_v58 = vadd.f32 %v719_v30, %v493_v50  ;;  %v513_v26 = vadd.f32 %v512_v21, %v337_v19 }
 0x144   : > { %v514_v45 = vpop.f32.mrf.mxu0  ;;  %v724_v49 = vpop.f32.mrf.mxu1 }
 0x145   : > { %v3767_v4 = vadd.f32 %v724_v49, %v502_v56  ;;  %v515_v6 = vadd.f32 %v514_v45, %v338_v36 }
 0x146   : > { %v3765_v32 = vpop.f32.mrf.mxu0  ;;  %v726_v41 = vpop.f32.mrf.mxu1 }
 0x147   : > { %v3771_v35 = vadd.f32 %v726_v41, %v504_v24 }
 0x148   : > { %v3769_v5 = vpop.f32.mrf.mxu0  ;;  %v731_v46 = vpop.f32.mrf.mxu1 }
 0x149   : > { %v3773_v11 = vadd.f32 %v731_v46, %v513_v26  ;;  %v339_v46 = vld [vmem:[#allocation7 + $0x60] sm:$0xff] }
 0x14a   : > { %v534_v10 = vpop.f32.mrf.mxu0  ;;  %v733_v60 = vpop.f32.mrf.mxu1 }
 0x14b   : > { %v3777_v16 = vadd.f32 %v733_v60, %v515_v6  ;;  %v341_v6 = vld [vmem:[#allocation7 + $0x70] sm:$0xff] }
 0x14c   : > { %v3775_v12 = vpop.f32.mrf.mxu0  ;;  %v3779_v17 = vpop.f32.mrf.mxu1 }
 0x14e   : > { %v854_v18 = vpop.f32.mrf.mxu0  ;;  %v3781_v25 = vpop.f32.mrf.mxu1 }
 0x14f   : > { %v855_v23 = vadd.f32 %v854_v18, %v697_v1 }
 0x150   : > { %v856_v31 = vpop.f32.mrf.mxu0  ;;  %v3783_v34 = vpop.f32.mrf.mxu1 }
 0x151   : > { %v857_v33 = vadd.f32 %v856_v31, %v699_v39  ;;  %v342_v31 = vld [vmem:[#allocation7 + $0x78] sm:$0xff] }
 0x152   : > { %v862_v37 = vpop.f32.mrf.mxu0  ;;  %v3785_v51 = vpop.f32.mrf.mxu1 }
 0x153   : > { %v863_v42 = vadd.f32 %v862_v37, %v704_v62  ;;  %v524_v37 = vadd.f32 %v3765_v32, %v339_v46 }
 0x154   : > { %v864_v61 = vpop.f32.mrf.mxu0  ;;  %v1002_v7 = vpop.f32.mrf.mxu1 }
 0x155   : > { %v865_v2 = vadd.f32 %v864_v61, %v706_v20  ;;  %v1003_v15 = vadd.f32 %v1002_v7, %v855_v23  ;;  %v340_v23 = vld [vmem:[#allocation7 + $0x68] sm:$0xff] }
 0x156   : > { %v870_v8 = vpop.f32.mrf.mxu0  ;;  %v1004_v44 = vpop.f32.mrf.mxu1 }
 0x157   : > { %v1005_v53 = vadd.f32 %v1004_v44, %v857_v33 }
 0x158   : > { %v3787_v48 = vpop.f32.mrf.mxu0  ;;  %v1011_v1 = vpop.f32.mrf.mxu1 }
 0x159   : > { %v1012_v54 = vadd.f32 %v1011_v1, %v863_v42  ;;  %v535_v42 = vadd.f32 %v534_v10, %v341_v6  ;;  %v526_v1 = vadd.f32 %v3769_v5, %v340_v23 }
 0x15a   : > { %v878_v22 = vpop.f32.mrf.mxu0  ;;  %v1013_v59 = vpop.f32.mrf.mxu1 }
 0x15b   : > { %v1014_v3 = vadd.f32 %v1013_v59, %v865_v2  ;;  %v537_v59 = vadd.f32 %v3775_v12, %v342_v31  ;;  %v741_v32 = vadd.f32 %v3781_v25, %v526_v1  ;;  %v746_v10 = vadd.f32 %v3783_v34, %v535_v42 }
 0x15c   : > { %v880_v39 = vpop.f32.mrf.mxu0  ;;  %v1020_v38 = vpop.f32.mrf.mxu1  ;;  %v879_v5 = vadd.f32 %v878_v22, %v3761_v43 }
 0x15d   : > { %v881_v25 = vadd.f32 %v880_v39, %v3763_v58 }
 0x15e   : > { %v886_v47 = vpop.f32.mrf.mxu0  ;;  %v3789_v62 = vpop.f32.mrf.mxu1 }
 0x160   : > { %v888_v55 = vpop.f32.mrf.mxu0  ;;  %v1029_v63 = vpop.f32.mrf.mxu1 }
 0x161   : > { %v1030_v43 = vadd.f32 %v1029_v63, %v879_v5 }
 0x162   : > { %v894_v20 = vpop.f32.mrf.mxu0  ;;  %v1031_v57 = vpop.f32.mrf.mxu1 }
 0x164   : > { %v3791_v40 = vpop.f32.mrf.mxu0  ;;  %v3793_v9 = vpop.f32.mrf.mxu1 }
 0x166   : > { %v3795_v29 = vpop.f32.mrf.mxu0  ;;  %v3797_v27 = vpop.f32.mrf.mxu1 }
 0x168   : > { %v3799_v28 = vpop.f32.mrf.mxu0  ;;  %v3801_v50 = vpop.f32.mrf.mxu1 }
 0x16a   : > { %v3803_v56 = vpop.f32.mrf.mxu0  ;;  %v3805_v21 = vpop.f32.mrf.mxu1 }
 0x16b   : > { %4618 = vst [vmem:[#allocation12_spill] sm:$0xff] %v3805_v21  ;;  %v911_v42 = vadd.f32 %v3803_v56, %v746_v10 }
 0x16c   : > { %v3807_v13 = vpop.f32.mrf.mxu0 }
 0x16d   : > { %4619 = vst [vmem:[#allocation13_spill] sm:$0xff] %v3807_v13  ;;  %v739_v13 = vadd.f32 %v3779_v17, %v524_v37  ;;  %v873_v17 = vadd.f32 %v3787_v48, %v3759_v52 }
 0x16e   : > { %v1191_v19 = vpop.f32.mrf.mxu0  ;;  %v3809_v30 = vpop.f32.mrf.mxu1 }
 0x16f   : > { %4620 = vst [vmem:[#allocation14_spill] sm:$0xff] %v3809_v30  ;;  %v1192_v2 = vadd.f32 %v1191_v19, %v1003_v15  ;;  %v871_v15 = vadd.f32 %v870_v8, %v3757_v14  ;;  %v748_v19 = vadd.f32 %v3785_v51, %v537_v59  ;;  %v887_v8 = vadd.f32 %v886_v47, %v3767_v4 }
 0x170   : > { %v1193_v45 = vpop.f32.mrf.mxu0  ;;  %v3811_v49 = vpop.f32.mrf.mxu1  ;;  %v895_v51 = vadd.f32 %v894_v20, %v3773_v11  ;;  %v897_v4 = vadd.f32 %v3791_v40, %v3777_v16 }
 0x171   : > { %4621 = vst [vmem:[#allocation15_spill] sm:$0xff] %v3811_v49  ;;  %v1021_v34 = vadd.f32 %v1020_v38, %v871_v15  ;;  %v1039_v47 = vadd.f32 %v3793_v9, %v887_v8 }
 0x172   : > { %v1198_v24 = vpop.f32.mrf.mxu0 }
 0x173   : > { %v3813_v26 = vpop.f32.mrf.mxu1  ;;  %v1199_v7 = vadd.f32 %v1198_v24, %v1012_v54 }
 0x174   : > { %4622 = vst [vmem:[#allocation16_spill] sm:$0xff] %v3813_v26  ;;  %v1200_v36 = vpop.f32.mrf.mxu0 }
 0x175   : > { %v3815_v41 = vpop.f32.mrf.mxu1  ;;  %v1201_v26 = vadd.f32 %v1200_v36, %v1014_v3  ;;  %v1023_v36 = vadd.f32 %v3789_v62, %v873_v17 }
 0x176   : > { %4623 = vst [vmem:[#allocation17_spill] sm:$0xff] %v3815_v41  ;;  %v1205_v60 = vpop.f32.mrf.mxu0  ;;  %v1194_v41 = vadd.f32 %v1193_v45, %v1005_v53 }
 0x177   : > { %v1330_v18 = vpop.f32.mrf.mxu1  ;;  %v1206_v48 = vadd.f32 %v1205_v60, %v1021_v34  ;;  %v905_v60 = vadd.f32 %v3799_v28, %v741_v32  ;;  %v4625_v28 = vld [vmem:[#allocation12_spill] sm:$0xff]  ;;  %v4626_v32 = vld [vmem:[#allocation14_spill] sm:$0xff] }
 0x178   : > { %v1207_v33 = vpop.f32.mrf.mxu0  ;;  %v3820_v49 = vadd.f32 %v1330_v18, %v1192_v2  ;;  %v1050_v2 = vadd.f32 %v4625_v28, %v897_v4 }
 0x179   : > { %v1332_v61 = vpop.f32.mrf.mxu1  ;;  %v1208_v63 = vadd.f32 %v1207_v33, %v1023_v36 }
 0x17a   : > { %v1212_v44 = vpop.f32.mrf.mxu0  ;;  %v3829_v12 = vadd.f32 %v1332_v61, %v1194_v41  ;;  %v1032_v41 = vadd.f32 %v1031_v57, %v881_v25  ;;  %v903_v57 = vadd.f32 %v3795_v29, %v739_v13  ;;  %v1048_v61 = vadd.f32 %v3801_v50, %v895_v51  ;;  %v4624_v29 = vld [vmem:[#allocation13_spill] sm:$0xff] }
 0x17b   : > { %v1337_v0 = vpop.f32.mrf.mxu1  ;;  %v1213_v58 = vadd.f32 %v1212_v44, %v1030_v43  ;;  %v913_v13 = vadd.f32 %v4624_v29, %v748_v19 }
 0x17c   : > { %v3822_v30 = vadd.f32 %v1337_v0, %v1199_v7  ;;  %v1214_v21 = vpop.f32.mrf.mxu0  ;;  %v1057_v15 = vadd.f32 %v4626_v32, %v903_v57 }
 0x17d   : > { %v1339_v54 = vpop.f32.mrf.mxu1  ;;  %v1215_v6 = vadd.f32 %v1214_v21, %v1032_v41  ;;  %v4629_v56 = vld [vmem:[#allocation17_spill] sm:$0xff] }
 0x17e   : > { %v1384_v53 = vmax.f32 %v3820_v49, %v3822_v30  ;;  %v3833_v3 = vadd.f32 %v1339_v54, %v1201_v26  ;;  %v1219_v0 = vpop.f32.mrf.mxu0  ;;  %v889_v26 = vadd.f32 %v888_v55, %v3771_v35  ;;  %v4627_v54 = vld [vmem:[#allocation15_spill] sm:$0xff]  ;;  %v1068_v10 = vadd.f32 %v4629_v56, %v913_v13 }
 0x17f   : > { %v1344_v14 = vpop.f32.mrf.mxu1  ;;  %v1059_v5 = vadd.f32 %v4627_v54, %v905_v60  ;;  %v1220_v43 = vadd.f32 %v1219_v0, %v1039_v47 }
 0x180   : > { %v1385_v22 = vrot.slane %v1384_v53, 4  ;;  %v1391_v45 = vmax.f32 %v3829_v12, %v3833_v3  ;;  %v1221_v24 = vpop.f32.mrf.mxu0  ;;  %v3848_v62 = vadd.f32 %v1344_v14, %v1206_v48  ;;  %v1041_v23 = vadd.f32 %v3797_v27, %v889_v26 }
 0x181   : > { %v1346_v52 = vpop.f32.mrf.mxu1 }
 0x182   : > { %v1386_v39 = vmax.f32 %v1384_v53, %v1385_v22  ;;  %v1392_v38 = vrot.slane %v1391_v45, 4  ;;  %v1226_v46 = vpop.f32.mrf.mxu0  ;;  %v3855_v31 = vadd.f32 %v1346_v52, %v1208_v63  ;;  %v4628_v53 = vld [vmem:[#allocation16_spill] sm:$0xff]  ;;  %v1222_v22 = vadd.f32 %v1221_v24, %v1041_v23 }
 0x183   : > { %v1351_v18 = vpop.f32.mrf.mxu1  ;;  %v1066_v17 = vadd.f32 %v4628_v53, %v911_v42 }
 0x184   : > { %v1387_v35 = vrot.slane %v1386_v39, 2  ;;  %v1393_v55 = vmax.f32 %v1391_v45, %v1392_v38  ;;  %v3850_v11 = vadd.f32 %v1351_v18, %v1213_v58  ;;  %v1228_v20 = vpop.f32.mrf.mxu0  ;;  %v1227_v45 = vadd.f32 %v1226_v46, %v1048_v61 }
 0x185   : > { %v1353_v16 = vpop.f32.mrf.mxu1  ;;  %v1229_v26 = vadd.f32 %v1228_v20, %v1050_v2 }
 0x186   : > { %v1388_v40 = vmax.f32 %v1386_v39, %v1387_v35  ;;  %v1394_v9 = vrot.slane %v1393_v55, 2  ;;  %v1398_v21 = vmax.f32 %v3848_v62, %v3850_v11  ;;  %v3859_v33 = vadd.f32 %v1353_v16, %v1215_v6  ;;  %v1233_v37 = vpop.f32.mrf.mxu0 }
 0x187   : > { %v1358_v27 = vpop.f32.mrf.mxu1  ;;  %v1234_v39 = vadd.f32 %v1233_v37, %v1057_v15 }
 0x188   : > { %v1389_v7 = vrot.slane %v1388_v40, 1  ;;  %v1395_v44 = vmax.f32 %v1393_v55, %v1394_v9  ;;  %v1399_v1 = vrot.slane %v1398_v21, 4  ;;  %v1405_v59 = vmax.f32 %v3855_v31, %v3859_v33  ;;  %v1235_v50 = vpop.f32.mrf.mxu0 }
 0x189   : > { %v1360_v25 = vpop.f32.mrf.mxu1  ;;  %v3873_v38 = vadd.f32 %v1358_v27, %v1220_v43 }
 0x18a   : > { %v1390_v19 = vmax.f32 %v1388_v40, %v1389_v7  ;;  %v1396_v34 = vrot.slane %v1395_v44, 1  ;;  %v1400_v14 = vmax.f32 %v1398_v21, %v1399_v1  ;;  %v1406_v8 = vrot.slane %v1405_v59, 4  ;;  %v1240_v4 = vpop.f32.mrf.mxu0 }
 0x18b   : > { %v1365_v36 = vpop.f32.mrf.mxu1  ;;  %v3883_v60 = vadd.f32 %v1360_v25, %v1222_v22  ;;  %v1241_v21 = vadd.f32 %v1240_v4, %v1066_v17 }
 0x18c   : > { %v1440_v51 = vsub.f32 %v3820_v49, %v1390_v19  ;;  %v1442_v41 = vsub.f32 %v3822_v30, %v1390_v19  ;;  %v1397_v52 = vmax.f32 %v1395_v44, %v1396_v34  ;;  %v1401_v48 = vrot.slane %v1400_v14, 2 }
 0x18d   : > { %v1407_v58 = vmax.f32 %v1405_v59, %v1406_v8  ;;  %v3875_v63 = vadd.f32 %v1365_v36, %v1227_v45  ;;  %v1367_v6 = vpop.f32.mrf.mxu1 }
 0x18e   : > { %v1456_v18 = vmul.f32 1.442695, %v1440_v51  ;;  %v1460_v0 = vmul.f32 1.442695, %v1442_v41  ;;  %v1441_v24 = vsub.f32 %v3829_v12, %v1397_v52  ;;  %v1443_v46 = vsub.f32 %v3833_v3, %v1397_v52  ;;  %v1242_v12 = vpop.f32.mrf.mxu0 }
 0x18f   : > { %v1402_v47 = vmax.f32 %v1400_v14, %v1401_v48  ;;  %v1408_v49 = vrot.slane %v1407_v58, 2  ;;  %v1412_v30 = vmax.f32 %v3873_v38, %v3875_v63  ;;  %v3881_v35 = vadd.f32 %v1367_v6, %v1229_v26  ;;  %v1372_v55 = vpop.f32.mrf.mxu1 }
 0x190   : > { %2845 = vpow2.f32 %v1456_v18  ;;  %v1458_v20 = vmul.f32 1.442695, %v1441_v24  ;;  %v1462_v57 = vmul.f32 1.442695, %v1443_v46  ;;  %v1236_v3 = vadd.f32 %v1235_v50, %v1059_v5 }
 0x191   : > { %2847 = vpow2.f32 %v1460_v0  ;;  %v1403_v23 = vrot.slane %v1402_v47, 1  ;;  %v1409_v16 = vmax.f32 %v1407_v58, %v1408_v49  ;;  %v1413_v40 = vrot.slane %v1412_v30, 4  ;;  %v1374_v9 = vpop.f32.mrf.mxu1 }
 0x192   : > { %2849 = vpow2.f32 %v1458_v20  ;;  %v1419_v37 = vmax.f32 %v3883_v60, %v3881_v35  ;;  %v1243_v28 = vadd.f32 %v1242_v12, %v1068_v10  ;;  %v3887_v27 = vadd.f32 %v1372_v55, %v1234_v39 }
 0x193   : > { %2851 = vpow2.f32 %v1462_v57  ;;  %v1404_v42 = vmax.f32 %v1402_v47, %v1403_v23  ;;  %v1410_v61 = vrot.slane %v1409_v16, 1  ;;  %v1414_v29 = vmax.f32 %v1412_v30, %v1413_v40  ;;  %v1379_v13 = vpop.f32.mrf.mxu1 }
 0x194   : > { %v1420_v2 = vrot.slane %v1419_v37, 4  ;;  %v3889_v7 = vadd.f32 %v1379_v13, %v1241_v21  ;;  %v3893_v5 = vadd.f32 %v1374_v9, %v1236_v3 }
 0x195   : > { %v1444_v44 = vsub.f32 %v3848_v62, %v1404_v42  ;;  %v1446_v1 = vsub.f32 %v3850_v11, %v1404_v42  ;;  %v1411_v59 = vmax.f32 %v1409_v16, %v1410_v61  ;;  %v1415_v32 = vrot.slane %v1414_v29, 2  ;;  %v1381_v15 = vpop.f32.mrf.mxu1 }
 0x196   : > { %v1421_v54 = vmax.f32 %v1419_v37, %v1420_v2  ;;  %v1426_v53 = vmax.f32 %v3887_v27, %v3889_v7  ;;  %v3897_v17 = vadd.f32 %v1381_v15, %v1243_v28  ;;  %v1994_v2 = vld [vmem:[%s4545_s4] sm:$0xff] }
 0x197   : > { %v1464_v56 = vmul.f32 1.442695, %v1444_v44  ;;  %v1468_v10 = vmul.f32 1.442695, %v1446_v1  ;;  %v1445_v50 = vsub.f32 %v3855_v31, %v1411_v59  ;;  %v1447_v25 = vsub.f32 %v3859_v33, %v1411_v59 }
 0x198   : > { %v1416_v62 = vmax.f32 %v1414_v29, %v1415_v32  ;;  %v1422_v19 = vrot.slane %v1421_v54, 2  ;;  %v1427_v11 = vrot.slane %v1426_v53, 4  ;;  %v1433_v34 = vmax.f32 %v3893_v5, %v3897_v17 }
 0x199   : > { %2853 = vpow2.f32 %v1464_v56  ;;  %v1466_v14 = vmul.f32 1.442695, %v1445_v50  ;;  %v1470_v8 = vmul.f32 1.442695, %v1447_v25  ;;  %v3085_v32 = vmov 0  }
 0x19a   : > { %2855 = vpow2.f32 %v1468_v10  ;;  %v1417_v43 = vrot.slane %v1416_v62, 1  ;;  %v1423_v22 = vmax.f32 %v1421_v54, %v1422_v19  ;;  %v1428_v45 = vmax.f32 %v1426_v53, %v1427_v11  ;;  %2844 = vset.pattern.permute.xlu0 %v3085_v32 }
 0x19b   : > { %2857 = vpow2.f32 %v1466_v14  ;;  %v1434_v26 = vrot.slane %v1433_v34, 4  ;;  %1998 = vperm.xlu0 %2844, %v1994_v2  }
 0x19c   : > { %2859 = vpow2.f32 %v1470_v8  ;;  %v1418_v36 = vmax.f32 %v1416_v62, %v1417_v43  ;;  %v1424_v31 = vrot.slane %v1423_v22, 1  ;;  %v1429_v51 = vrot.slane %v1428_v45, 2 }
 0x19d   : > { %v3903_v33 = vpop.eup %2845  ;;  %v1435_v41 = vmax.f32 %v1433_v34, %v1434_v26 }
 0x19e   : > { %v3905_v52 = vpop.eup %2847  ;;  %v1448_v48 = vsub.f32 %v3873_v38, %v1418_v36  ;;  %v1450_v58 = vsub.f32 %v3875_v63, %v1418_v36  ;;  %v1425_v39 = vmax.f32 %v1423_v22, %v1424_v31  ;;  %v1430_v4 = vmax.f32 %v1428_v45, %v1429_v51 }
 0x19f   : > { %v3909_v6 = vpop.eup %2849  ;;  %v1488_v18 = vadd.f32 %v3905_v52, %v3903_v33  ;;  %v1436_v0 = vrot.slane %v1435_v41, 2  ;;  %v1568_v22 = vlaneseq }
 0x1a0   : > { %v3913_v24 = vpop.eup %2851  ;;  %v1472_v46 = vmul.f32 1.442695, %v1448_v48  ;;  %v1476_v47 = vmul.f32 1.442695, %v1450_v58  ;;  %v1449_v49 = vsub.f32 %v3883_v60, %v1425_v39  ;;  %v1451_v30 = vsub.f32 %v3881_v35, %v1425_v39 }
 0x1a1   : > { %v1489_v55 = vrot.slane %v1488_v18, 4  ;;  %v1495_v38 = vadd.f32 %v3913_v24, %v3909_v6  ;;  %v1431_v63 = vrot.slane %v1430_v4, 1  ;;  %v1437_v20 = vmax.f32 %v1435_v41, %v1436_v0 }
 0x1a2   : > { %2861 = vpow2.f32 %v1472_v46  ;;  %v1474_v57 = vmul.f32 1.442695, %v1449_v49  ;;  %v1478_v23 = vmul.f32 1.442695, %v1451_v30 }
 0x1a3   : > { %v1490_v16 = vadd.f32 %v1489_v55, %v1488_v18  ;;  %v1496_v40 = vrot.slane %v1495_v38, 4  ;;  %2863 = vpow2.f32 %v1476_v47  ;;  %v1432_v12 = vmax.f32 %v1430_v4, %v1431_v63  ;;  %v1992_v47 = vld [vmem:[%s4544_s3] sm:$0xff] }
 0x1a4   : > { %2865 = vpow2.f32 %v1474_v57  ;;  %v1438_v9 = vrot.slane %v1437_v20, 1  ;;  %v1569_v18 = vshrl.u32 %v1568_v22, 7 }
 0x1a5   : > { %v1491_v3 = vrot.slane %v1490_v16, 2  ;;  %v1497_v21 = vadd.f32 %v1496_v40, %v1495_v38  ;;  %2867 = vpow2.f32 %v1478_v23  ;;  %v1452_v35 = vsub.f32 %v3887_v27, %v1432_v12  ;;  %v1993_v40 = vld [vmem:[%s4544_s3 + $0x8] sm:$0xff] }
 0x1a6   : > { %v3920_v60 = vpop.eup %2853  ;;  %v1454_v37 = vsub.f32 %v3889_v7, %v1432_v12  ;;  %v1439_v42 = vmax.f32 %v1437_v20, %v1438_v9  ;;  %v3960_v23 = vsub.s32 0, %v1569_v18  ;;  %v3968_v9 = vsub.s32 1, %v1569_v18 }
 0x1a7   : > { %v3923_v61 = vpop.eup %2855  ;;  %v1492_v29 = vadd.f32 %v1491_v3, %v1490_v16  ;;  %v1498_v13 = vrot.slane %v1497_v21, 2  ;;  %v1480_v28 = vmul.f32 1.442695, %v1452_v35  ;;  %v2008_v16 = vsel %vm2006_vm1, %v1992_v47, 0 }
 0x1a8   : > { %v3928_v44 = vpop.eup %2857  ;;  %v1502_v1 = vadd.f32 %v3923_v61, %v3920_v60  ;;  %v1484_v27 = vmul.f32 1.442695, %v1454_v37  ;;  %v1453_v59 = vsub.f32 %v3893_v5, %v1439_v42  ;;  %v1455_v7 = vsub.f32 %v3897_v17, %v1439_v42  ;;  %v1995_v5 = vld [vmem:[%s4545_s4 + $0x8] sm:$0xff] }
 0x1a9   : > { %v3934_v15 = vpop.eup %2859  ;;  %v1493_v54 = vrot.slane %v1492_v29, 1  ;;  %v1499_v53 = vadd.f32 %v1498_v13, %v1497_v21  ;;  %2869 = vpow2.f32 %v1480_v28  ;;  %2003 = vperm.xlu0 %2844, %v1995_v5   ;;  %v3970_v3 = vsub.s32 2, %v1569_v18 }
 0x1aa   : > { %v1503_v56 = vrot.slane %v1502_v1, 4  ;;  %v1509_v10 = vadd.f32 %v3934_v15, %v3928_v44  ;;  %2871 = vpow2.f32 %v1484_v27  ;;  %v1482_v50 = vmul.f32 1.442695, %v1453_v59 }
 0x1ab   : > { %v1494_v25 = vadd.f32 %v1493_v54, %v1492_v29  ;;  %v1500_v17 = vrot.slane %v1499_v53, 1  ;;  %v1486_v62 = vmul.f32 1.442695, %v1455_v7  ;;  %v3974_v42 = vsub.s32 3, %v1569_v18 }
 0x1ac   : > { %v1504_v19 = vadd.f32 %v1503_v56, %v1502_v1  ;;  %v1510_v11 = vrot.slane %v1509_v10, 4  ;;  %2873 = vpow2.f32 %v1482_v50  ;;  %v3976_v29 = vsub.s32 4, %v1569_v18 }
 0x1ad   : > { %2875 = vrcp.f32 %v1494_v25  ;;  %v1501_v34 = vadd.f32 %v1500_v17, %v1499_v53  ;;  %v3978_v2 = vsub.s32 5, %v1569_v18  ;;  %v3980_v1 = vand.u32 4294901760, %v2008_v16 }
 0x1ae   : > { %v1505_v14 = vrot.slane %v1504_v19, 2  ;;  %v1511_v8 = vadd.f32 %v1510_v11, %v1509_v10  ;;  %2877 = vpow2.f32 %v1486_v62  ;;  %v3983_v27 = vsel %vm2006_vm1, %v1993_v40, 0 }
 0x1af   : > { %v3941_v43 = vpop.eup %2861  ;;  %2879 = vrcp.f32 %v1501_v34  ;;  %4630 = vst [vmem:[#allocation13_spill] sm:$0xff] %v3980_v1  ;;  %4631 = vst [vmem:[#allocation12_spill] sm:$0xff] %v3983_v27  ;;  %v3995_v5 = vsub.s32 6, %v1569_v18  ;;  %v3997_v25 = vsub.s32 7, %v1569_v18  ;;  %v4006_v34 = vsub.f32 %v2008_v16, %v3980_v1 }
 0x1b0   : > { %v3943_v45 = vpop.eup %2863  ;;  %v1506_v26 = vadd.f32 %v1505_v14, %v1504_v19  ;;  %v1512_v36 = vrot.slane %v1511_v8, 2  ;;  %v4009_v14 = vand.u32 4294901760, %v3983_v27 }
 0x1b1   : > { %v3945_v31 = vpop.eup %2865  ;;  %v1516_v51 = vadd.f32 %v3943_v45, %v3941_v43  ;;  %4636 = vst [vmem:[#allocation18_spill] sm:$0xff] %v4006_v34 }
 0x1b2   : > { %v3949_v41 = vpop.eup %2867  ;;  %v1507_v48 = vrot.slane %v1506_v26, 1  ;;  %v1513_v58 = vadd.f32 %v1512_v36, %v1511_v8  ;;  %4637 = vst [vmem:[#allocation19_spill] sm:$0xff] %v4009_v14 }
 0x1b3   : > { %v1517_v39 = vrot.slane %v1516_v51, 4  ;;  %v1523_v4 = vadd.f32 %v3949_v41, %v3945_v31 }
 0x1b4   : > { %v1508_v0 = vadd.f32 %v1507_v48, %v1506_v26  ;;  %v1514_v46 = vrot.slane %v1513_v58, 1  ;;  %v4020_v48 = vld [vmem:[%s3249_s16 + $0x8] sm:$0xff] }
 0x1b5   : > { %v1518_v49 = vadd.f32 %v1517_v39, %v1516_v51  ;;  %v1524_v30 = vrot.slane %v1523_v4, 4  ;;  %v4024_v39 = vld [vmem:[%s3249_s16 + $0x18] sm:$0xff] }
 0x1b6   : > { %v3956_v55 = vpop.eup %2869  ;;  %2881 = vrcp.f32 %v1508_v0  ;;  %v1515_v38 = vadd.f32 %v1514_v46, %v1513_v58 }
 0x1b7   : > { %v3958_v63 = vpop.eup %2871  ;;  %v1519_v20 = vrot.slane %v1518_v49, 2  ;;  %v1525_v57 = vadd.f32 %v1524_v30, %v1523_v4 }
 0x1b8   : > { %2883 = vrcp.f32 %v1515_v38  ;;  %v1530_v12 = vadd.f32 %v3958_v63, %v3956_v55 }
 0x1b9   : > { %v3972_v21 = vpop.eup %2873  ;;  %v1520_v35 = vadd.f32 %v1519_v20, %v1518_v49  ;;  %v1526_v37 = vrot.slane %v1525_v57, 2  ;;  %v4034_v20 = vld [vmem:[%s3249_s16 + $0x28] sm:$0xff] }
 0x1ba   : > { %v2876_v13 = vpop.eup %2875  ;;  %v1531_v28 = vrot.slane %v1530_v12, 4 }
 0x1bb   : > { %v3985_v59 = vpop.eup %2877  ;;  %v3988_v7 = vmul.f32 %v2876_v13, %v3903_v33  ;;  %v1521_v32 = vrot.slane %v1520_v35, 1  ;;  %v1527_v54 = vadd.f32 %v1526_v37, %v1525_v57  ;;  %v3991_v53 = vmul.f32 %v2876_v13, %v3905_v52 }
 0x1bc   : > { %v2880_v56 = vpop.eup %2879  ;;  %v1532_v10 = vadd.f32 %v1531_v28, %v1530_v12  ;;  %v1537_v50 = vadd.f32 %v3985_v59, %v3972_v21 }
 0x1bd   : > { %4632 = vst [vmem:[#allocation14_spill] sm:$0xff] %v3988_v7  ;;  %4633 = vst [vmem:[#allocation15_spill] sm:$0xff] %v3991_v53  ;;  %v4000_v17 = vmul.f32 %v2880_v56, %v3909_v6  ;;  %v1522_v62 = vadd.f32 %v1521_v32, %v1520_v35  ;;  %v1528_v33 = vrot.slane %v1527_v54, 1  ;;  %v4003_v19 = vmul.f32 %v2880_v56, %v3913_v24 }
 0x1be   : > { %v1533_v52 = vrot.slane %v1532_v10, 2  ;;  %v1538_v11 = vrot.slane %v1537_v50, 4 }
 0x1bf   : > { %4634 = vst [vmem:[#allocation16_spill] sm:$0xff] %v4000_v17  ;;  %4635 = vst [vmem:[#allocation17_spill] sm:$0xff] %v4003_v19  ;;  %2885 = vrcp.f32 %v1522_v62  ;;  %v1529_v8 = vadd.f32 %v1528_v33, %v1527_v54  ;;  %v1575_v6 = vrot.slane %v4000_v17, %v3960_v23  ;;  %v1615_v22 = vrot.slane %v4000_v17, %v3968_v9  ;;  %v4050_v54 = vld [vmem:[%s3249_s16 + $0x38] sm:$0xff] }
 0x1c0   : > { %v1534_v26 = vadd.f32 %v1533_v52, %v1532_v10  ;;  %v1539_v24 = vadd.f32 %v1538_v11, %v1537_v50  ;;  %v1663_v36 = vrot.slane %v4000_v17, %v3970_v3  ;;  %v1711_v51 = vrot.slane %v4000_v17, %v3974_v42  ;;  %v4056_v10 = vld [vmem:[%s3249_s16 + $0x48] sm:$0xff] }
 0x1c1   : > { %2887 = vrcp.f32 %v1529_v8  ;;  %v1601_v58 = vmul.f32 %v4020_v48, %v1575_v6  ;;  %v1641_v4 = vmul.f32 %v4024_v39, %v1615_v22  ;;  %v1759_v18 = vrot.slane %v4000_v17, %v3976_v29  ;;  %v4074_v6 = vld [vmem:[%s3249_s16 + $0x68] sm:$0xff] }
 0x1c2   : > { %v1535_v0 = vrot.slane %v1534_v26, 1  ;;  %v1540_v46 = vrot.slane %v1539_v24, 2  ;;  %v1689_v57 = vmul.f32 %v4034_v20, %v1663_v36  ;;  %v1807_v16 = vrot.slane %v4000_v17, %v3978_v2 }
 0x1c3   : > { %v2882_v30 = vpop.eup %2881  ;;  %v1649_v38 = vadd.f32 %v1641_v4, %v1601_v58  ;;  %v1855_v40 = vrot.slane %v4000_v17, %v3995_v5  ;;  %v4053_v56 = vmul.f32 %v4050_v54, %v1711_v51  ;;  %v4059_v50 = vmul.f32 %v4056_v10, %v1759_v18 }
 0x1c4   : > { %v4042_v12 = vmul.f32 %v2882_v30, %v3920_v60  ;;  %v1536_v35 = vadd.f32 %v1535_v0, %v1534_v26  ;;  %v1541_v37 = vadd.f32 %v1540_v46, %v1539_v24  ;;  %v4045_v13 = vmul.f32 %v2882_v30, %v3923_v61  ;;  %v4062_v60 = vld [vmem:[%s3249_s16 + $0x58] sm:$0xff] }
 0x1c5   : > { %v2884_v28 = vpop.eup %2883  ;;  %v4047_v32 = vadd.f32 %v1689_v57, %v1649_v38  ;;  %4641 = vst [vmem:[#allocation23_spill] sm:$0xff] %v4053_v56  ;;  %4642 = vst [vmem:[#allocation24_spill] sm:$0xff] %v4059_v50  ;;  %v4065_v62 = vmul.f32 %v4062_v60, %v1807_v16  ;;  %v4077_v22 = vmul.f32 %v4074_v6, %v1855_v40 }
 0x1c6   : > { %4638 = vst [vmem:[#allocation20_spill] sm:$0xff] %v4042_v12  ;;  %4639 = vst [vmem:[#allocation21_spill] sm:$0xff] %v4045_v13  ;;  %v1557_v61 = vmul.f32 %v2884_v28, %v3928_v44  ;;  %2889 = vrcp.f32 %v1536_v35  ;;  %v1542_v33 = vrot.slane %v1541_v37, 1  ;;  %v1559_v52 = vmul.f32 %v2884_v28, %v3934_v15 }
 0x1c7   : > { %4640 = vst [vmem:[#allocation22_spill] sm:$0xff] %v4047_v32  ;;  %4643 = vst [vmem:[#allocation25_spill] sm:$0xff] %v4065_v62  ;;  %v1579_v11 = vrot.slane %v4042_v12, %v3960_v23  ;;  %v1619_v8 = vrot.slane %v4042_v12, %v3968_v9  ;;  %v1667_v30 = vrot.slane %v4042_v12, %v3970_v3 }
 0x1c8   : > { %4644 = vst [vmem:[#allocation26_spill] sm:$0xff] %v4077_v22  ;;  %v1543_v24 = vadd.f32 %v1542_v33, %v1541_v37  ;;  %v1583_v44 = vrot.slane %v1557_v61, %v3960_v23  ;;  %v1623_v36 = vrot.slane %v1557_v61, %v3968_v9  ;;  %v1671_v15 = vrot.slane %v1557_v61, %v3970_v3 }
 0x1c9   : > { %v1719_v51 = vrot.slane %v1557_v61, %v3974_v42  ;;  %v1767_v58 = vrot.slane %v1557_v61, %v3976_v29  ;;  %v1815_v4 = vrot.slane %v1557_v61, %v3978_v2  ;;  %v1863_v18 = vrot.slane %v1557_v61, %v3995_v5 }
 0x1ca   : > { %2891 = vrcp.f32 %v1543_v24  ;;  %v1603_v0 = vmul.f32 %v4020_v48, %v1583_v44  ;;  %v1643_v46 = vmul.f32 %v4024_v39, %v1623_v36  ;;  %v1691_v38 = vmul.f32 %v4034_v20, %v1671_v15 }
 0x1cb   : > { %v4094_v57 = vmul.f32 %v4050_v54, %v1719_v51  ;;  %v4097_v16 = vmul.f32 %v4056_v10, %v1767_v58  ;;  %v1715_v40 = vrot.slane %v4042_v12, %v3974_v42  ;;  %v4102_v28 = vmul.f32 %v4062_v60, %v1815_v4  ;;  %v4116_v51 = vld [vmem:[%s3249_s16] sm:$0xff] }
 0x1cc   : > { %v2886_v35 = vpop.eup %2885  ;;  %v1651_v37 = vadd.f32 %v1643_v46, %v1603_v0  ;;  %v1911_v33 = vrot.slane %v1557_v61, %v3997_v25  ;;  %v1959_v24 = vrot.slane %v1559_v52, %v3960_v23  ;;  %v4113_v15 = vmul.f32 %v4074_v6, %v1863_v18  ;;  %v4124_v52 = vld [vmem:[%s3249_s16 + $0x78] sm:$0xff]  ;;  %v4130_v0 = vld [vmem:[%s3249_s16 + $0x10] sm:$0xff]  ;;  %v4136_v18 = vld [vmem:[%s3249_s16 + $0x20] sm:$0xff] }
 0x1cd   : > { %4645 = vst [vmem:[#allocation27_spill] sm:$0xff] %v4102_v28  ;;  %v4107_v44 = vmul.f32 %v2886_v35, %v3941_v43  ;;  %v4110_v36 = vmul.f32 %v2886_v35, %v3943_v45  ;;  %v4119_v58 = vmul.f32 %v4116_v51, %v1579_v11  ;;  %v4133_v45 = vmul.f32 %v4130_v0, %v1619_v8  ;;  %v4146_v35 = vld [vmem:[%s3249_s16 + $0x88] sm:$0xff]  ;;  %v4237_v12 = vld [vmem:[%s3249_s16 + $0x60] sm:$0xff] }
 0x1ce   : > { %4646 = vst [vmem:[#allocation28_spill] sm:$0xff] %v4113_v15  ;;  %v2888_v4 = vpop.eup %2887  ;;  %v4121_v61 = vadd.f32 %v1691_v38, %v1651_v37  ;;  %v4127_v43 = vmul.f32 %v4124_v52, %v1911_v33  ;;  %v4139_v46 = vmul.f32 %v4136_v18, %v1667_v30  ;;  %v4149_v37 = vmul.f32 %v4146_v35, %v1959_v24  ;;  %v4152_v33 = vld [vmem:[%s3249_s16 + $0x30] sm:$0xff] }
 0x1cf   : > { %v1561_v11 = vmul.f32 %v2888_v4, %v3945_v31  ;;  %v4143_v38 = vmul.f32 %v2888_v4, %v3949_v41  ;;  %v4155_v8 = vmul.f32 %v4152_v33, %v1715_v40 }
 0x1d0   : > { %4647 = vst [vmem:[#allocation29_spill] sm:$0xff] %v4127_v43  ;;  %4648 = vst [vmem:[#allocation30_spill] sm:$0xff] %v4139_v46 }
 0x1d1   : > { %4649 = vst [vmem:[#allocation31_spill] sm:$0xff] %v4149_v37  ;;  %4650 = vst [vmem:[#allocation32_spill] sm:$0xff] %v4155_v8  ;;  %v1591_v24 = vrot.slane %v1561_v11, %v3960_v23  ;;  %v1631_v4 = vrot.slane %v1561_v11, %v3968_v9  ;;  %v1679_v49 = vrot.slane %v1561_v11, %v3970_v3  ;;  %v4222_v37 = vld [vmem:[%s3249_s16 + $0x40] sm:$0xff]  ;;  %v4226_v8 = vld [vmem:[%s3249_s16 + $0x50] sm:$0xff] }
 0x1d2   : > { %v1727_v40 = vrot.slane %v1561_v11, %v3974_v42  ;;  %v1775_v47 = vrot.slane %v1561_v11, %v3976_v29  ;;  %v1823_v26 = vrot.slane %v1561_v11, %v3978_v2  ;;  %v1871_v30 = vrot.slane %v1561_v11, %v3995_v5 }
 0x1d3   : > { %v2890_v1 = vpop.eup %2889  ;;  %v1605_v41 = vmul.f32 %v4020_v48, %v1591_v24  ;;  %v1645_v53 = vmul.f32 %v4024_v39, %v1631_v4  ;;  %v1919_v17 = vrot.slane %v1561_v11, %v3997_v25  ;;  %v1693_v34 = vmul.f32 %v4034_v20, %v1679_v49 }
 0x1d4   : > { %v1564_v27 = vmul.f32 %v2890_v1, %v3956_v55  ;;  %v4181_v14 = vmul.f32 %v2890_v1, %v3958_v63  ;;  %v1741_v62 = vmul.f32 %v4050_v54, %v1727_v40  ;;  %v1789_v7 = vmul.f32 %v4056_v10, %v1775_v47 }
 0x1d5   : > { %v1653_v31 = vadd.f32 %v1645_v53, %v1605_v41  ;;  %v4187_v24 = vmul.f32 %v4062_v60, %v1823_v26  ;;  %v4190_v11 = vmul.f32 %v4074_v6, %v1871_v30  ;;  %v4199_v47 = vmul.f32 %v4124_v52, %v1919_v17 }
 0x1d6   : > { %v1595_v4 = vrot.slane %v1564_v27, %v3960_v23  ;;  %v1635_v55 = vrot.slane %v1564_v27, %v3968_v9  ;;  %v1683_v63 = vrot.slane %v1564_v27, %v3970_v3  ;;  %v1731_v1 = vrot.slane %v1564_v27, %v3974_v42 }
 0x1d7   : > { %v2892_v49 = vpop.eup %2891  ;;  %v1779_v40 = vrot.slane %v1564_v27, %v3976_v29  ;;  %v1827_v53 = vrot.slane %v1564_v27, %v3978_v2  ;;  %4651 = vst [vmem:[#allocation33_spill] sm:$0xff] %v4199_v47  ;;  %v1967_v26 = vrot.slane %v4143_v38, %v3960_v23  ;;  %v1875_v22 = vrot.slane %v1564_v27, %v3995_v5 }
 0x1d8   : > { %v1565_v30 = vmul.f32 %v2892_v49, %v3972_v21  ;;  %v1567_v41 = vmul.f32 %v2892_v49, %v3985_v59  ;;  %v1923_v50 = vrot.slane %v1564_v27, %v3997_v25  ;;  %v1606_v19 = vmul.f32 %v4116_v51, %v1595_v4 }
 0x1d9   : > { %v1646_v56 = vmul.f32 %v4130_v0, %v1635_v55  ;;  %v1694_v17 = vmul.f32 %v4136_v18, %v1683_v63  ;;  %v1742_v32 = vmul.f32 %v4152_v33, %v1731_v1  ;;  %v1790_v43 = vmul.f32 %v4222_v37, %v1779_v40 }
 0x1da   : > { %v1599_v38 = vrot.slane %v1565_v30, %v3960_v23  ;;  %v1639_v21 = vrot.slane %v1565_v30, %v3968_v9  ;;  %v1687_v59 = vrot.slane %v1565_v30, %v3970_v3  ;;  %v1735_v49 = vrot.slane %v1565_v30, %v3974_v42 }
 0x1db   : > { %v1783_v13 = vrot.slane %v1565_v30, %v3976_v29  ;;  %v1831_v27 = vrot.slane %v1565_v30, %v3978_v2  ;;  %v1879_v4 = vrot.slane %v1565_v30, %v3995_v5  ;;  %v1927_v55 = vrot.slane %v1565_v30, %v3997_v25 }
 0x1dc   : > { %v1607_v63 = vmul.f32 %v4020_v48, %v1599_v38  ;;  %v1647_v1 = vmul.f32 %v4024_v39, %v1639_v21  ;;  %v1838_v15 = vmul.f32 %v4226_v8, %v1827_v53  ;;  %v1695_v46 = vmul.f32 %v4034_v20, %v1687_v59 }
 0x1dd   : > { %v1743_v28 = vmul.f32 %v4050_v54, %v1735_v49  ;;  %v1791_v30 = vmul.f32 %v4056_v10, %v1783_v13  ;;  %v1839_v47 = vmul.f32 %v4062_v60, %v1831_v27  ;;  %v1887_v39 = vmul.f32 %v4074_v6, %v1879_v4  ;;  %v4243_v60 = vld [vmem:[%s3249_s16 + $0x70] sm:$0xff] }
 0x1de   : > { %v1655_v48 = vadd.f32 %v1647_v1, %v1607_v63  ;;  %v1975_v38 = vrot.slane %v1567_v41, %v3960_v23  ;;  %v1654_v21 = vadd.f32 %v1646_v56, %v1606_v19  ;;  %v1935_v40 = vmul.f32 %v4124_v52, %v1927_v55 }
 0x1df   : > { %v1886_v53 = vmul.f32 %v4237_v12, %v1875_v22  ;;  %v1971_v20 = vrot.slane %v4181_v14, %v3960_v23  ;;  %v1701_v54 = vadd.f32 %v1693_v34, %v1653_v31  ;;  %v1934_v6 = vmul.f32 %v4243_v60, %v1923_v50 }
 0x1e0   : > { %v1703_v13 = vadd.f32 %v1695_v46, %v1655_v48  ;;  %v1702_v10 = vadd.f32 %v1694_v17, %v1654_v21  ;;  %v4652_v19 = vrot.slane %v4107_v44, %v3960_v23  ;;  %v1983_v41 = vmul.f32 %v4146_v35, %v1975_v38  ;;  %v4257_v17 = vld [vmem:[%s3249_s16 + $0x80] sm:$0xff]  ;;  %s2610_s16 = scalar_lea.sflag [#allocation4], %s3245_s12 }
 0x1e1   : > { %v1749_v59 = vadd.f32 %v1741_v62, %v1701_v54  ;;  %v1981_v22 = vmul.f32 %v4146_v35, %v1967_v26  ;;  %v4653_v14 = vrot.slane %v4107_v44, %v3968_v9  ;;  %v1982_v50 = vmul.f32 %v4257_v17, %v1971_v20 }
 0x1e2   : > { %v1604_v56 = vmul.f32 %v4116_v51, %v4652_v19  ;;  %v1751_v46 = vadd.f32 %v1743_v28, %v1703_v13  ;;  %v1750_v31 = vadd.f32 %v1742_v32, %v1702_v10  ;;  %v4654_v49 = vrot.slane %v4107_v44, %v3970_v3 }
 0x1e3   : > { %v1644_v34 = vmul.f32 %v4130_v0, %v4653_v14  ;;  %v1797_v4 = vadd.f32 %v1789_v7, %v1749_v59  ;;  %v4655_v26 = vrot.slane %v4107_v44, %v3974_v42  ;;  %v1867_v28 = vrot.slane %v4107_v44, %v3995_v5 }
 0x1e4   : > { %v1692_v27 = vmul.f32 %v4136_v18, %v4654_v49  ;;  %v1799_v32 = vadd.f32 %v1791_v30, %v1751_v46  ;;  %v1798_v63 = vadd.f32 %v1790_v43, %v1750_v31  ;;  %v4656_v1 = vrot.slane %v4107_v44, %v3976_v29  ;;  %v4658_v46 = vld [vmem:[#allocation20_spill] sm:$0xff] }
 0x1e5   : > { %v1652_v62 = vadd.f32 %v1644_v34, %v1604_v56  ;;  %v1740_v55 = vmul.f32 %v4152_v33, %v4655_v26  ;;  %v4657_v38 = vrot.slane %v4107_v44, %v3978_v2  ;;  %v1845_v21 = vadd.f32 %v4187_v24, %v1797_v4 }
 0x1e6   : > { %v1788_v48 = vmul.f32 %v4222_v37, %v4656_v1  ;;  %v1915_v54 = vrot.slane %v4107_v44, %v3997_v25  ;;  %v1747_v30 = vadd.f32 %v4094_v57, %v4121_v61  ;;  %v1847_v43 = vadd.f32 %v1839_v47, %v1799_v32  ;;  %v4659_v61 = vld [vmem:[#allocation33_spill] sm:$0xff] }
 0x1e7   : > { %v1836_v7 = vmul.f32 %v4226_v8, %v4657_v38  ;;  %v1700_v20 = vadd.f32 %v1692_v27, %v1652_v62  ;;  %v1846_v13 = vadd.f32 %v1838_v15, %v1798_v63  ;;  %v1884_v10 = vmul.f32 %v4237_v12, %v1867_v28 }
 0x1e8   : > { %v1963_v19 = vrot.slane %v4110_v36, %v3960_v23  ;;  %v1893_v56 = vadd.f32 %v4190_v11, %v1845_v21  ;;  %v1795_v14 = vadd.f32 %v4097_v16, %v1747_v30  ;;  %v1650_v24 = vadd.f32 %v4133_v45, %v4119_v58  ;;  %v4660_v36 = vld [vmem:[#allocation27_spill] sm:$0xff]  ;;  %v4661_v11 = vld [vmem:[#allocation30_spill] sm:$0xff] }
 0x1e9   : > { %v1748_v59 = vadd.f32 %v1740_v55, %v1700_v20  ;;  %v1895_v34 = vadd.f32 %v1887_v39, %v1847_v43  ;;  %v1894_v44 = vadd.f32 %v1886_v53, %v1846_v13  ;;  %v1763_v57 = vrot.slane %v4658_v46, %v3976_v29  ;;  %v4662_v53 = vld [vmem:[#allocation28_spill] sm:$0xff]  ;;  %v4665_v30 = vld [vmem:[#allocation31_spill] sm:$0xff] }
 0x1ea   : > { %v1811_v15 = vrot.slane %v4658_v46, %v3978_v2  ;;  %v1941_v47 = vadd.f32 %v4659_v61, %v1893_v56  ;;  %v1843_v49 = vadd.f32 %v4660_v36, %v1795_v14  ;;  %v1698_v27 = vadd.f32 %v4661_v11, %v1650_v24  ;;  %v4663_v55 = vld [vmem:[#allocation32_spill] sm:$0xff]  ;;  %v4666_v56 = vld [vmem:[#allocation21_spill] sm:$0xff]  ;;  %v4671_v11 = vld [vmem:[#allocation14_spill] sm:$0xff] }
 0x1eb   : > { %v1796_v31 = vadd.f32 %v1788_v48, %v1748_v59  ;;  %v1943_v4 = vadd.f32 %v1935_v40, %v1895_v34  ;;  %v1942_v16 = vadd.f32 %v1934_v6, %v1894_v44  ;;  %v1932_v62 = vmul.f32 %v4243_v60, %v1915_v54  ;;  %v4664_v48 = vld [vmem:[#allocation29_spill] sm:$0xff]  ;;  %v4668_v34 = vld [vmem:[#allocation23_spill] sm:$0xff]  ;;  %v4670_v36 = vld [vmem:[#allocation24_spill] sm:$0xff] }
 0x1ec   : > { %v1786_v58 = vmul.f32 %v4222_v37, %v1763_v57  ;;  %v4299_v45 = vadd.f32 %v1981_v22, %v1941_v47  ;;  %v1891_v26 = vadd.f32 %v4662_v53, %v1843_v49  ;;  %v1746_v28 = vadd.f32 %v4663_v55, %v1698_v27  ;;  %v4669_v61 = vld [vmem:[#allocation17_spill] sm:$0xff] }
 0x1ed   : > { %v1844_v39 = vadd.f32 %v1836_v7, %v1796_v31  ;;  %v1991_v32 = vadd.f32 %v1983_v41, %v1943_v4  ;;  %v1990_v63 = vadd.f32 %v1982_v50, %v1942_v16  ;;  %v1859_v1 = vrot.slane %v4658_v46, %v3995_v5  ;;  %v4674_v55 = vld [vmem:[#allocation25_spill] sm:$0xff] }
 0x1ee   : > { %v1907_v40 = vrot.slane %v4658_v46, %v3997_v25  ;;  %v1939_v38 = vadd.f32 %v4664_v48, %v1891_v26  ;;  %v1794_v21 = vadd.f32 %v1786_v58, %v1746_v28  ;;  %v1834_v22 = vmul.f32 %v4226_v8, %v1811_v15  ;;  %v4677_v48 = vld [vmem:[#allocation12_spill] sm:$0xff] }
 0x1ef   : > { %v1892_v6 = vadd.f32 %v1884_v10, %v1844_v39  ;;  %v4309_v20 = vand.u32 4294901760, %v1991_v32  ;;  %v4311_v7 = vand.u32 4294901760, %v1990_v63  ;;  %v1980_v54 = vmul.f32 %v4257_v17, %v1963_v19  ;;  %v4667_v19 = vld [vmem:[#allocation22_spill] sm:$0xff] }
 0x1f0   : > { %v1882_v41 = vmul.f32 %v4237_v12, %v1859_v1  ;;  %v1987_v43 = vadd.f32 %v4665_v30, %v1939_v38  ;;  %v1842_v13 = vadd.f32 %v1834_v22, %v1794_v21  ;;  %v1955_v10 = vrot.slane %v4666_v56, %v3960_v23  ;;  %v4679_v22 = vld [vmem:[#allocation16_spill] sm:$0xff] }
 0x1f1   : > { %v1940_v50 = vadd.f32 %v1932_v62, %v1892_v6  ;;  %2038 = vmatprep.subr.mxu0 %v4309_v20  ;;  %v4320_v59 = vsub.f32 %v1990_v63, %v4311_v7  ;;  %v4323_v14 = vand.u32 4294901760, %v4299_v45  ;;  %v1930_v24 = vmul.f32 %v4243_v60, %v1907_v40  ;;  %v4675_v40 = vld [vmem:[#allocation18_spill] sm:$0xff] }
 0x1f2   : > { %v1745_v44 = vadd.f32 %v4668_v34, %v4667_v19  ;;  %2040 = vmatpush1.msra.mxu0 %v4311_v7  ;;  %v4329_v57 = vand.u32 4294901760, %v1987_v43  ;;  %v1890_v15 = vadd.f32 %v1882_v41, %v1842_v13  ;;  %v1951_v47 = vrot.slane %v4669_v61, %v3960_v23 }
 0x1f3   : > { %v1988_v46 = vadd.f32 %v1980_v54, %v1940_v50  ;;  %2042 = vmatprep.subr.mxu0 %v4323_v14  ;;  %v1978_v31 = vmul.f32 %v4257_v17, %v1955_v10  ;;  %v4672_v27 = vrot.slane %v4671_v11, %v3960_v23  ;;  %v4673_v16 = vrot.slane %v4671_v11, %v3968_v9 }
 0x1f4   : > { %v1793_v49 = vadd.f32 %v4670_v36, %v1745_v44  ;;  %v1938_v39 = vadd.f32 %v1930_v24, %v1890_v15  ;;  %v1659_v53 = vrot.slane %v4671_v11, %v3970_v3  ;;  %v1707_v26 = vrot.slane %v4671_v11, %v3974_v42  ;;  %v4676_v3 = vld [vmem:[#allocation19_spill] sm:$0xff] }
 0x1f5   : > { %v1600_v4 = vmul.f32 %v4116_v51, %v4672_v27  ;;  %v1640_v62 = vmul.f32 %v4130_v0, %v4673_v16  ;;  %v4344_v58 = vand.u32 4294901760, %v1988_v46  ;;  %v1755_v51 = vrot.slane %v4671_v11, %v3976_v29  ;;  %v4678_v29 = vld [vmem:[#allocation26_spill] sm:$0xff] }
 0x1f6   : > { %v1841_v28 = vadd.f32 %v4674_v55, %v1793_v49  ;;  %v1803_v9 = vrot.slane %v4671_v11, %v3978_v2  ;;  %v1986_v0 = vadd.f32 %v1978_v31, %v1938_v39  ;;  %v1688_v1 = vmul.f32 %v4136_v18, %v1659_v53 }
 0x1f7   : > { %v1648_v63 = vadd.f32 %v1640_v62, %v1600_v4  ;;  %2044 = vmatpush1.msra.mxu0 %v4344_v58  ;;  %v2088_v6 = vand.u32 4294901760, %v4675_v40  ;;  %v4360_v38 = vsub.f32 %v4677_v48, %v4676_v3  ;;  %v4363_v42 = vsub.f32 %v1988_v46, %v4344_v58 }
 0x1f8   : > { %2046 = vmatprep.subr.mxu0 %v4329_v57  ;;  %v1889_v21 = vadd.f32 %v4678_v29, %v1841_v28  ;;  %v4680_v2 = vrot.slane %v4679_v22, %v3997_v25  ;;  %v1977_v18 = vmul.f32 %v4146_v35, %v1951_v47  ;;  %v4372_v41 = vand.u32 4294901760, %v1986_v0  ;;  %v4681_v47 = vld [vmem:[#allocation15_spill] sm:$0xff] }
 0x1f9   : > { %v1696_v50 = vadd.f32 %v1688_v1, %v1648_v63  ;;  %v1736_v30 = vmul.f32 %v4152_v33, %v1707_v26  ;;  %v1784_v13 = vmul.f32 %v4222_v37, %v1755_v51  ;;  %v1832_v10 = vmul.f32 %v4226_v8, %v1803_v9 }
 0x1fa   : > { %v1929_v54 = vmul.f32 %v4124_v52, %v4680_v2  ;;  %v4378_v24 = vsub.f32 %v1991_v32, %v4309_v20  ;;  %v2140_v19 = vand.u32 4294901760, %v4320_v59  ;;  %2048 = vmatpush1.msra.mxu0 %v4372_v41  ;;  %v4383_v52 = vsub.f32 %v1986_v0, %v4372_v41 }
 0x1fb   : > { %v1744_v35 = vadd.f32 %v1736_v30, %v1696_v50  ;;  %v1851_v34 = vrot.slane %v4671_v11, %v3995_v5  ;;  %v1899_v37 = vrot.slane %v4671_v11, %v3997_v25  ;;  %v4395_v44 = vsub.f32 %v4299_v45, %v4323_v14 }
 0x1fc   : > { %v1937_v56 = vadd.f32 %v1929_v54, %v1889_v21  ;;  %v2134_v8 = vand.u32 4294901760, %v4378_v24  ;;  %v2141_v32 = vsub.f32 %v4320_v59, %v2140_v19  ;;  %v2152_v15 = vand.u32 4294901760, %v4363_v42 }
 0x1fd   : > { %v1792_v46 = vadd.f32 %v1784_v13, %v1744_v35  ;;  %v4399_v61 = vsub.f32 %v1987_v43, %v4329_v57  ;;  %v2164_v5 = vand.u32 4294901760, %v4383_v52  ;;  %v1947_v31 = vrot.slane %v4681_v47, %v3960_v23  ;;  %v4683_v35 = vld [vmem:[#allocation13_spill] sm:$0xff] }
 0x1fe   : > { %v1985_v33 = vadd.f32 %v1977_v18, %v1937_v56  ;;  %v2135_v36 = vsub.f32 %v4378_v24, %v2134_v8  ;;  %v2146_v45 = vand.u32 4294901760, %v4395_v44  ;;  %v1880_v11 = vmul.f32 %v4237_v12, %v1851_v34 }
 0x1ff   : > { %v1840_v49 = vadd.f32 %v1832_v10, %v1792_v46  ;;  %v2153_v43 = vsub.f32 %v4363_v42, %v2152_v15  ;;  %v2158_v27 = vand.u32 4294901760, %v4399_v61  ;;  %v1928_v4 = vmul.f32 %v4243_v60, %v1899_v37 }
 0x200   : > { %v4402_v25 = vand.u32 4294901760, %v1985_v33  ;;  %v2136_v23 = vand.u32 4294901760, %v2135_v36  ;;  %v2147_v16 = vsub.f32 %v4395_v44, %v2146_v45  ;;  %v2142_v53 = vand.u32 4294901760, %v2141_v32 }
 0x201   : > { %v1888_v39 = vadd.f32 %v1880_v11, %v1840_v49  ;;  %v2159_v12 = vsub.f32 %v4399_v61, %v2158_v27  ;;  %v2165_v26 = vsub.f32 %v4383_v52, %v2164_v5  ;;  %v2089_v55 = vsub.f32 %v4675_v40, %v2088_v6 }
 0x202   : > { %2050 = vmatprep.subr.mxu0 %v4402_v25  ;;  %v4419_v62 = vsub.f32 %v1985_v33, %v4402_v25  ;;  %2137 = vmatprep.subr.mxu1 %v2136_v23  ;;  %v2148_v60 = vand.u32 4294901760, %v2147_v16  ;;  %v2099_v28 = vand.u32 4294901760, %v4360_v38  ;;  %v1976_v9 = vmul.f32 %v4257_v17, %v1947_v31 }
 0x203   : > { %v1936_v51 = vadd.f32 %v1928_v4, %v1888_v39  ;;  %2143 = vmatpush1.msra.mxu1 %v2142_v53  ;;  %v2154_v0 = vand.u32 4294901760, %v2153_v43  ;;  %v2160_v1 = vand.u32 4294901760, %v2159_v12  ;;  %v2166_v21 = vand.u32 4294901760, %v2165_v26 }
 0x204   : > { %v2170_v63 = vand.u32 4294901760, %v4419_v62  ;;  %2149 = vmatprep.subr.mxu1 %v2148_v60  ;;  %v2090_v22 = vand.u32 4294901760, %v2089_v55  ;;  %v2100_v2 = vsub.f32 %v4360_v38, %v2099_v28  ;;  %v4682_v30 = vmov 0.0  }
 0x205   : > { %v1984_v29 = vadd.f32 %v1976_v9, %v1936_v51  ;;  %2155 = vmatpush1.msra.mxu1 %v2154_v0 }
 0x206   : > { %v2171_v48 = vsub.f32 %v4419_v62, %v2170_v63  ;;  %2161 = vmatprep.subr.mxu1 %v2160_v1  ;;  %v2101_v50 = vand.u32 4294901760, %v2100_v2 }
 0x207   : > { %v2051_v18 = vand.u32 4294901760, %v1984_v29  ;;  %2167 = vmatpush1.msra.mxu1 %v2166_v21 }
 0x208   : > { %v2172_v54 = vand.u32 4294901760, %v2171_v48 }
 0x209   : > { %2052 = vmatpush1.msra.mxu0 %v2051_v18  ;;  %v2175_v17 = vsub.f32 %v1984_v29, %v2051_v18 }
 0x20a   : > { %2173 = vmatprep.subr.mxu1 %v2172_v54  ;;  %2253 = vmatprep.subr.mxu0 %v4378_v24 }
 0x20b   : > { %2091 = vmatmul.mubr.f32.vlgmr.msra.gmra.mxu0 %v2090_v22  ;;  %v2176_v13 = vand.u32 4294901760, %v2175_v17 }
 0x20c   : > { %2256 = vmatpush1.msra.mxu0 %v4320_v59  ;;  %2096 = vmatprep.mubr.f32.mxu0 %v4682_v30 }
 0x20d   : > { %2259 = vmatprep.subr.mxu0 %v4395_v44  ;;  %v2177_v56 = vsub.f32 %v2175_v17, %v2176_v13 }
 0x20e   : > { %2262 = vmatpush1.msra.mxu0 %v4363_v42 }
 0x20f   : > { %2265 = vmatprep.subr.mxu0 %v4399_v61  ;;  %2102 = vmatmul.mubr.f32.gmra.mxu0 %v2101_v50  ;;  %v2178_v10 = vand.u32 4294901760, %v2177_v56 }
 0x210   : > { %2268 = vmatpush1.msra.mxu0 %v4383_v52  ;;  %2307 = vmatprep.mubr.f32.mxu0 %v4682_v30 }
 0x211   : > { %2271 = vmatprep.subr.mxu0 %v4419_v62  ;;  %2179 = vmatpush1.msra.mxu1 %v2178_v10 }
 0x212   : > { %2274 = vmatpush1.msra.mxu0 %v2175_v17  ;;  %2349 = vmatprep.subr.mxu1 %v4309_v20 }
 0x213   : > { %2442 = vmatprep.subr.mxu0 %v2134_v8  ;;  %2214 = vmatmul.mubr.f32.vlgmr.msra.gmra.mxu1 %v4683_v35 }
 0x214   : > { %2310 = vmatmul.mubr.f32.vlgmr.msra.gmra.mxu0 %v4675_v40  ;;  %2351 = vmatpush1.msra.mxu1 %v4311_v7 }
 0x215   : > { %2446 = vmatpush1.msra.mxu0 %v2140_v19  ;;  %2353 = vmatprep.subr.mxu1 %v4323_v14 }
 0x216   : > { %2450 = vmatprep.subr.mxu0 %v2146_v45  ;;  %2355 = vmatpush1.msra.mxu1 %v4344_v58 }
 0x217   : > { %2454 = vmatpush1.msra.mxu0 %v2152_v15  ;;  %2219 = vmatprep.mubr.f32.mxu1 %v4682_v30 }
 0x218   : > { %2357 = vmatprep.subr.mxu1 %v4329_v57  ;;  %2458 = vmatprep.subr.mxu0 %v2158_v27 }
 0x219   : > { %2221 = vmatmul.mubr.f32.gmra.mxu1 %v4676_v3  ;;  %2462 = vmatpush1.msra.mxu0 %v2164_v5 }
 0x21a   : > { %2359 = vmatpush1.msra.mxu1 %v4372_v41  ;;  %2466 = vmatprep.subr.mxu0 %v2170_v63 }
 0x21b   : > { %2361 = vmatprep.subr.mxu1 %v4402_v25  ;;  %2470 = vmatpush1.msra.mxu0 %v2176_v13 }
 0x21c   : > { %2363 = vmatpush1.msra.mxu1 %v2051_v18  ;;  %2396 = vmatprep.mubr.f32.mxu1 %v4682_v30 }
 0x21d   : > { %2543 = vmatprep.subr.mxu1 %v4309_v20  ;;  %2400 = vmatmul.mubr.f32.vlgmr.msra.gmra.mxu1 %v2088_v6 }
 0x21e   : > { %2315 = vmatprep.mubr.f32.mxu0 %v4682_v30  ;;  %2545 = vmatpush1.msra.mxu1 %v4311_v7 }
 0x21f   : > { %2318 = vmatmul.mubr.f32.gmra.mxu0 %v4360_v38  ;;  %2547 = vmatprep.subr.mxu1 %v4323_v14  ;;  %v1999_v14 = vpop.permute.xlu0 %1998 }
 0x220   : > { %2405 = vmatprep.mubr.f32.mxu1 %v4682_v30  ;;  %2549 = vmatpush1.msra.mxu1 %v4344_v58 }
 0x221   : > { %2503 = vmatprep.mubr.f32.mxu0 %v4682_v30  ;;  %2551 = vmatprep.subr.mxu1 %v4329_v57 }
 0x222   : > { %2409 = vmatmul.mubr.f32.gmra.mxu1 %v2099_v28 }
 0x223   : > { %2553 = vmatpush1.msra.mxu1 %v4372_v41  ;;  %2505 = vmatmul.mubr.f32.vlgmr.msra.gmra.mxu0 %v4683_v35 }
 0x224   : > { %2555 = vmatprep.subr.mxu1 %v4402_v25  ;;  %2590 = vmatprep.mubr.f32.mxu1 %v4682_v30  ;;  %v2004_v42 = vpop.permute.xlu0 %2003 }
 0x225   : > { %2557 = vmatpush1.msra.mxu1 %v2051_v18  ;;  %2510 = vmatprep.mubr.f32.mxu0 %v4682_v30 }
 0x226   : > { %2592 = vmatmul.mubr.f32.vlgmr.msra.gmra.mxu1 %v4683_v35 }
 0x227   : > { %2512 = vmatmul.mubr.f32.gmra.mxu0 %v4676_v3  ;;  %2597 = vmatprep.mubr.f32.mxu1 %v4682_v30 }
 0x22a   : > { %2599 = vmatmul.mubr.f32.gmra.mxu1 %v4676_v3 }
 0x2cb   : > { %v2092_v20 = vpop.f32.mrf.mxu0 }
 0x2cc   : > { %v2093_v38 = vadd.f32 %v2092_v20, %v1999_v14 }
 0x2cd   : > { %v2094_v7 = vpop.f32.mrf.mxu0 }
 0x2ce   : > { %v2095_v19 = vadd.f32 %v2094_v7, %v1999_v14 }
 0x2cf   : > { %v2103_v59 = vpop.f32.mrf.mxu0 }
 0x2d0   : > { %v2104_v37 = vadd.f32 %v2103_v59, %v2004_v42 }
 0x2d1   : > { %v2105_v57 = vpop.f32.mrf.mxu0 }
 0x2d2   : > { %v2106_v44 = vadd.f32 %v2105_v57, %v2004_v42 }
 0x2d3   : > { %v2215_v58 = vpop.f32.mrf.mxu1 }
 0x2d4   : > { %v2311_v6 = vpop.f32.mrf.mxu0  ;;  %v2216_v52 = vadd.f32 %v2215_v58, %v2093_v38 }
 0x2d5   : > { %v2217_v40 = vpop.f32.mrf.mxu1 }
 0x2d6   : > { %v2313_v34 = vpop.f32.mrf.mxu0  ;;  %v2218_v33 = vadd.f32 %v2217_v40, %v2095_v19  ;;  %v2312_v3 = vadd.f32 %v2311_v6, %v2216_v52 }
 0x2d8   : > { %v2314_v61 = vadd.f32 %v2313_v34, %v2218_v33 }
 0x2d9   : > { %v2222_v41 = vpop.f32.mrf.mxu1 }
 0x2da   : > { %v2223_v46 = vadd.f32 %v2222_v41, %v2104_v37 }
 0x2db   : > { %v2224_v24 = vpop.f32.mrf.mxu1 }
 0x2dc   : > { %v2225_v25 = vadd.f32 %v2224_v24, %v2106_v44 }
 0x2dd   : > { %v2401_v8 = vpop.f32.mrf.mxu1 }
 0x2de   : > { %v2402_v5 = vadd.f32 %v2401_v8, %v2312_v3 }
 0x2df   : > { %v2319_v32 = vpop.f32.mrf.mxu0  ;;  %v2403_v15 = vpop.f32.mrf.mxu1 }
 0x2e0   : > { %v2404_v36 = vadd.f32 %v2403_v15, %v2314_v61  ;;  %v2320_v45 = vadd.f32 %v2319_v32, %v2223_v46 }
 0x2e1   : > { %v2321_v47 = vpop.f32.mrf.mxu0 }
 0x2e2   : > { %v2410_v31 = vpop.f32.mrf.mxu1  ;;  %v2322_v43 = vadd.f32 %v2321_v47, %v2225_v25 }
 0x2e3   : > { %v2506_v49 = vpop.f32.mrf.mxu0  ;;  %v2411_v27 = vadd.f32 %v2410_v31, %v2320_v45 }
 0x2e4   : > { %v2412_v11 = vpop.f32.mrf.mxu1  ;;  %v2507_v4 = vadd.f32 %v2506_v49, %v2402_v5 }
 0x2e5   : > { %v2508_v23 = vpop.f32.mrf.mxu0  ;;  %v2413_v62 = vadd.f32 %v2412_v11, %v2322_v43 }
 0x2e6   : > { %v2593_v16 = vpop.f32.mrf.mxu1  ;;  %v2509_v39 = vadd.f32 %v2508_v23, %v2404_v36 }
 0x2e7   : > { %v2594_v53 = vadd.f32 %v2593_v16, %v2507_v4  ;;  %v2513_v12 = vpop.f32.mrf.mxu0 }
 0x2e8   : > { %v2595_v26 = vpop.f32.mrf.mxu1  ;;  %v2514_v55 = vadd.f32 %v2513_v12, %v2411_v27 }
 0x2e9   : > { %2605 = vst [vmem:[%s297_s11] sm:$0xff] %v2594_v53  ;;  %v2596_v60 = vadd.f32 %v2595_v26, %v2509_v39  ;;  %v2515_v28 = vpop.f32.mrf.mxu0 }
 0x2ea   : > { %v2600_v63 = vpop.f32.mrf.mxu1  ;;  %v2516_v51 = vadd.f32 %v2515_v28, %v2413_v62 }
 0x2eb   : > { %2606 = vst [vmem:[%s297_s11 + $0x8] sm:$0xff] %v2596_v60  ;;  %v2601_v9 = vadd.f32 %v2600_v63, %v2514_v55 }
 0x2ec   : > { %v2602_v0 = vpop.f32.mrf.mxu1 }
 0x2ed   : > { %2607 = vst [vmem:[%s297_s11 + $0x10] sm:$0xff] %v2601_v9  ;;  %v2603_v1 = vadd.f32 %v2602_v0, %v2516_v51 }
 0x2ef   : > { %2608 = vst [vmem:[%s297_s11 + $0x18] sm:$0xff] %v2603_v1 }
 0x2f0   : > { %3004 = shalt.err (!%p3001_p5)
}
 0x2f1   : > { %s3005_s17 = scalar_lea.hbm %s4493_s2, 512  ;;  %s3009_s25 = scalar_lea.hbm %s4546_s5, 1024 }
 0x2f2   : > { %p3006_p10 = scmp.ne.s32.totalorder %s4493_s2, %s3005_s17  ;;  %p3010_p6 = scmp.lt.s32.totalorder %s4493_s2, %s4546_s5 }
 0x2f3   : > { %p3011_p12 = scmp.lt.s32.totalorder %s3009_s25, %s3005_s17 }
 0x2f4   : > { %p3007_p1 = pnand %p3006_p10, %p3217_p7 }
 0x2f5   : > { %p3012_p3 = por %p3011_p12, %p3010_p6 }
 0x2f6   : > { %p3008_p4 = pneg %p3007_p1 }
 0x2f8   : > { %p3013_p8 = pnand %p3012_p3, %p3008_p4 }
 0x2fa   : > { %3016 = shalt.err (!%p3013_p8)
}
 0x2fb   : > { %s3087_s11 = smov 256   ;;  %s3088_s10 = smov 16  }
 0x2fc   : > { %2763 = dma.vmem_to_hbm [thread:$0]  (%p3217_p7), %s4488_s9, 512, %s4493_s2, %s2610_s16, %s3087_s11, %s3087_s11, %s3088_s10  }
 0x2fd PF: > { %s2640_s15 = sand.u32 1, %s3055_s18   ;;  %p4684_p9 = scmp.ne.s32.totalorder %s4588_s29, 0 }
 0x2fe   : > { %p4685_p11 = scmp.ge.s32.totalorder %s3075_s23, 2  ;;  %s2641_s1 = scalar_lea.sflag [#allocation4], %s2640_s15 }
 0x300   : > { %p2777_p2 = pnand %p4685_p11, %p4684_p9 }
 0x302   : > { %p2778_p13 = pneg %p2777_p2 }
 0x304   : > { %3050 = dma.done.wait (%p2778_p13), %s2641_s1, 512  }
 0x305   : > { %3052 = vsyncadd (%p2778_p13), %s2641_s1, 4294966784  ;;  %s22_s23 = sadd.s32 1, %s3075_s23   ;;  %s4686_s18 = smov %s3059_s19 }
 0x306   : > { %p19_p0 = scmp.ge.s32.totalorder %s22_s23, 4   ;;  %s4687_s19 = smov %s3063_s20 }
 0x307   : > { %s4688_s20 = smov %s3229_s14  ;;  %s4689_s21 = smov %s3071_s22 }
 0x308   : > { %s4690_s22 = smov %s4692_s7  ;;  %21 = sbr.rel (!%p19_p0) target bundleno = 10 (0xa), region = 94 }
 0x30d   :  { %2646 = vsyncpa [#allocation3], 1 }
 0x30e   :  { %2648 = vsyncpa [#allocation3 + $0x1], 1 }
 0x30f   :  { %2649 = vsyncpa [#allocation6], 1 }
 0x310   :  { %2650 = vsyncpa [#allocation4], 1 }
 0x311   :  { %2652 = vsyncpa [#allocation4 + $0x1], 1 }

</bundles_post_ra>
